<compile_context>
chip_gen: v6e
topology: v6e:2x2x1
jax: 0.10.0
libtpu: 0.0.40
codegen_flags: <defaults>
</compile_context>

<pallas_src>
import functools

import jax
import jax.numpy as jnp
from jax.experimental import pallas as pl
from jax.experimental.pallas import tpu as pltpu

_LN_EPS = 1e-5  # torch.nn.LayerNorm default


def _round_up(n, m):
    return ((n + m - 1) // m) * m


def _layernorm(x, gamma, beta):
    # Biased variance over the last (feature) axis, like torch.nn.LayerNorm.
    mean = jnp.mean(x, axis=-1, keepdims=True)
    var = jnp.mean((x - mean) ** 2, axis=-1, keepdims=True)
    return (x - mean) * jax.lax.rsqrt(var + _LN_EPS) * gamma + beta


# ----------------------------------------------------------------------------
# generation-aware policy helpers
# ----------------------------------------------------------------------------
def _device_kind():
    try:
        return jax.devices()[0].device_kind.lower()
    except Exception:
        return ""


def _vmem_budget_bytes():
    """~75% of per-core VMEM: leaves compiler scratch / pipeline headroom
    (~48 MiB on v7x's 64 MiB, ~96 MiB on v5e/v6e's 128 MiB)."""
    cap = None
    try:
        cap = int(getattr(pltpu.get_tpu_info(), "vmem_capacity_bytes", 0)) or None
    except Exception:
        cap = None
    if cap is None:
        cap = 64 << 20  # conservative: smallest current per-core VMEM (v7x)
    return (cap * 3) // 4


def _batch_row_align(compute_dtype):
    # bf16 packs 16 rows per vreg sublane-pair; f32 packs 8.
    return 16 if jnp.dtype(compute_dtype).itemsize < 4 else 8


def _pick_batch_tile(batch, compute_dtype):
    """Full-MXU batch tiles for large batches, >=2 tiles on dual-core chips."""
    row = _batch_row_align(compute_dtype)
    kind = _device_kind()
    pref = 128 if "v5" in kind else 256      # v5e MXU is 128-wide; v6e/v7x like 256
    dual_core = "v7" in kind                 # v7x: 2 TensorCores share the grid
    if batch >= 2 * pref:
        return pref
    if batch >= 256:
        return 128
    if dual_core and batch >= 16:
        # split mid-sized batches so the "parallel" axis has >=2 steps (2 TCs)
        return _round_up(-(-batch // 2), row)
    return _round_up(max(batch, 1), row)


# ----------------------------------------------------------------------------
# single-buffered constant operands (probed once; safe fallback)
# ----------------------------------------------------------------------------
_BUFFERED_ONE_OK = None


def _single_buffer_supported():
    """Probe whether this jax/Mosaic build accepts pipeline_mode=pl.Buffered(1)."""
    global _BUFFERED_ONE_OK
    if _BUFFERED_ONE_OK is not None:
        return _BUFFERED_ONE_OK
    ok = False
    if hasattr(pl, "Buffered"):
        try:
            def _probe(x_ref, c_ref, o_ref):
                o_ref[...] = x_ref[...] + c_ref[...]

            out = pl.pallas_call(
                _probe,
                out_shape=jax.ShapeDtypeStruct((8, 128), jnp.float32),
                grid_spec=pltpu.PrefetchScalarGridSpec(
                    num_scalar_prefetch=0,
                    grid=(1,),
                    in_specs=[
                        pl.BlockSpec((8, 128), lambda i: (0, 0)),
                        pl.BlockSpec((8, 128), lambda i: (0, 0),
                                     pipeline_mode=pl.Buffered(1)),
                    ],
                    out_specs=pl.BlockSpec((8, 128), lambda i: (0, 0)),
                ),
            )(jnp.zeros((8, 128), jnp.float32), jnp.ones((8, 128), jnp.float32))
            jax.block_until_ready(out)
            ok = bool(jnp.all(out == 1.0))
        except Exception:
            ok = False
    _BUFFERED_ONE_OK = ok
    return ok


def _const_spec(block_shape, index_map):
    """BlockSpec for an operand whose block never changes across the grid.
    Single-buffered (halves its VMEM residency) when supported."""
    if _single_buffer_supported():
        return pl.BlockSpec(block_shape, index_map, pipeline_mode=pl.Buffered(1))
    return pl.BlockSpec(block_shape, index_map)


# ----------------------------------------------------------------------------
# residual encoder kernels
# ----------------------------------------------------------------------------
def _residual_resident_kernel(
    x_ref,        # (TB, Dp)           input tile (padded feature dim)
    fc_w_ref,     # (Dp, H)            compute_dtype
    fc_b_ref,     # (1, H)             f32
    ln_g_ref,     # (NB, 1, H)         f32
    ln_b_ref,     # (NB, 1, H)         f32
    w1_ref,       # (NB, H, 4H)        compute_dtype
    b1_ref,       # (NB, 1, 4H)        f32
    w2_ref,       # (NB, 4H, H)        compute_dtype
    b2_ref,       # (NB, 1, H)         f32
    fin_g_ref,    # (1, H)             f32
    fin_b_ref,    # (1, H)             f32
    o_ref,        # (TB, H)
    *,
    compute_dtype,
    num_blocks,
):
    # x = self.fc(x)
    x = x_ref[...].astype(compute_dtype)
    h = jnp.dot(x, fc_w_ref[...], preferred_element_type=jnp.float32) + fc_b_ref[...]

    def block(i, h):
        # ResidualBlock: res + fc2(relu(fc1(LayerNorm(x))))
        z = _layernorm(h, ln_g_ref[i], ln_b_ref[i])
        z = jnp.dot(z.astype(compute_dtype), w1_ref[i],
                    preferred_element_type=jnp.float32) + b1_ref[i]
        z = jnp.maximum(z, 0.0)
        z = jnp.dot(z.astype(compute_dtype), w2_ref[i],
                    preferred_element_type=jnp.float32) + b2_ref[i]
        return h + z

    if num_blocks <= 4:
        # fully unrolled, static indices into the resident weight stacks
        for i in range(num_blocks):
            h = block(i, h)
    else:
        # dynamic leading-dim indexing keeps code size bounded for many blocks
        h = jax.lax.fori_loop(0, num_blocks, block, h)

    # x = self.norm(x)
    o_ref[...] = _layernorm(h, fin_g_ref[...], fin_b_ref[...]).astype(o_ref.dtype)


def _residual_streamed_kernel(
    x_ref, fc_w_ref, fc_b_ref, ln_g_ref, ln_b_ref,
    w1_ref,       # (1, H, 4H)  this block's weights (streamed per grid step)
    b1_ref, w2_ref, b2_ref, fin_g_ref, fin_b_ref,
    o_ref,
    h_ref,        # (TB, H) f32 scratch -- running activation carried across nb
    *,
    compute_dtype,
):
    # NOTE: correctness requires nb (grid axis 1) to be the innermost,
    # "arbitrary" axis: h_ref carries one batch tile's activation across nb.
    nb = pl.program_id(1)

    @pl.when(nb == 0)
    def _():
        x = x_ref[...].astype(compute_dtype)
        h_ref[...] = (
            jnp.dot(x, fc_w_ref[...], preferred_element_type=jnp.float32)
            + fc_b_ref[...]
        )

    h = h_ref[...]
    z = _layernorm(h, ln_g_ref[nb], ln_b_ref[nb])
    z = jnp.dot(z.astype(compute_dtype), w1_ref[0],
                preferred_element_type=jnp.float32) + b1_ref[nb]
    z = jnp.maximum(z, 0.0)
    z = jnp.dot(z.astype(compute_dtype), w2_ref[0],
                preferred_element_type=jnp.float32) + b2_ref[nb]
    h = h + z
    h_ref[...] = h

    @pl.when(nb == pl.num_programs(1) - 1)
    def _():
        o_ref[...] = _layernorm(h, fin_g_ref[...], fin_b_ref[...]).astype(o_ref.dtype)


# ----------------------------------------------------------------------------
# mlp encoder kernel
# ----------------------------------------------------------------------------
def _mlp_encoder_kernel(x_ref, w1_ref, b1_ref, w2_ref, b2_ref, o_ref, *, compute_dtype):
    x = x_ref[...].astype(compute_dtype)
    h = jnp.dot(x, w1_ref[...], preferred_element_type=jnp.float32) + b1_ref[...]
    h = jnp.maximum(h, 0.0)
    h = jnp.dot(h.astype(compute_dtype), w2_ref[...],
                preferred_element_type=jnp.float32) + b2_ref[...]
    h = jnp.maximum(h, 0.0)
    o_ref[...] = h.astype(o_ref.dtype)


# ----------------------------------------------------------------------------
# wrappers
# ----------------------------------------------------------------------------
def ppo_encoder_residual(x, params, *, batch_tile=None,
                         compute_dtype=jnp.bfloat16, weights_resident=None):
    """block_type == 'residual': fc -> num_blocks x ResidualBlock -> LayerNorm.

    compute_dtype is the matmul operand dtype (f32 accumulation and f32
    LayerNorm / bias / residual math always).  Use jnp.float32 to match the
    PyTorch float32 module; bfloat16 (default) is the fast path on all
    TPU generations.  weights_resident: None = auto (VMEM budget), True/False
    forces the resident / streamed structure.
    """
    B, D = x.shape
    H = params["fc_w"].shape[1]
    NB = params["w1"].shape[0]
    assert NB >= 1, "residual path requires num_blocks >= 1"
    assert H % 128 == 0, "hidden_dim should be a multiple of 128 (lane width)"

    row = _batch_row_align(compute_dtype)
    tb0 = (_round_up(batch_tile, row) if batch_tile is not None
           else _pick_batch_tile(B, compute_dtype))
    Dp = _round_up(D, 128)  # zero-pad K of the first matmul to full lanes

    bpe_w = jnp.dtype(compute_dtype).itemsize
    bpe_x = jnp.dtype(x.dtype).itemsize
    budget = _vmem_budget_bytes()

    blk_w_bytes = 8 * H * H * bpe_w               # one block's w1 + w2
    fc_w_bytes = Dp * H * bpe_w
    small_bytes = 4 * (3 * H + 7 * NB * H)        # f32 biases + LN params

    # Conservative estimates (assume double buffering everywhere; Buffered(1)
    # on constant operands only adds headroom on top of this).
    def est_resident(tb):
        return (2 * (fc_w_bytes + NB * blk_w_bytes) + 2 * small_bytes
                + 2 * tb * Dp * bpe_x + 2 * tb * H * bpe_x      # x / out tiles
                + tb * 4 * H * 4 + 3 * tb * H * 4               # f32 intermediates
                + (2 << 20))

    def est_streamed(tb):
        return (2 * (fc_w_bytes + blk_w_bytes) + 2 * small_bytes
                + 2 * tb * Dp * bpe_x + 2 * tb * H * bpe_x
                + tb * H * 4                                    # f32 carry scratch
                + tb * 4 * H * 4 + 3 * tb * H * 4
                + (2 << 20))

    def shrink(tb, est):
        while est(tb) > budget and tb > row:
            tb = max(row, _round_up(tb // 2, row))
        return tb

    tb_res = shrink(tb0, est_resident)
    if weights_resident is None:
        use_resident = est_resident(tb_res) <= budget
    else:
        use_resident = bool(weights_resident)

    # Matmul weights in compute dtype (bf16 halves weight DMA bytes); biases and
    # LayerNorm params stay f32 (VPU/EUP math is f32 on all generations).
    fc_w = params["fc_w"]
    if Dp != D:
        fc_w = jnp.pad(fc_w, ((0, Dp - D), (0, 0)))
    fc_w = fc_w.astype(compute_dtype)
    w1 = params["w1"].astype(compute_dtype)
    w2 = params["w2"].astype(compute_dtype)
    f32 = lambda a: a.astype(jnp.float32)
    fc_b, fin_g, fin_b = f32(params["fc_b"]), f32(params["fin_g"]), f32(params["fin_b"])
    ln_g, ln_b = f32(params["ln_g"]), f32(params["ln_b"])
    b1, b2 = f32(params["b1"]), f32(params["b2"])

    if use_resident:
        tb = tb_res
        est = est_resident(tb)
    else:
        tb = shrink(tb0, est_streamed)
        est = est_streamed(tb)
        # TODO(synk): chunk the 4*H dimension when even one block's weights
        # overflow the VMEM budget (very large hidden_dim on v7x).

    Bp = _round_up(B, tb)
    x_p = x if (Bp == B and Dp == D) else jnp.pad(x, ((0, Bp - B), (0, Dp - D)))
    n_tiles = Bp // tb
    vmem_limit = int(min(budget, max(est, 32 << 20)))

    weight_read_bytes = fc_w_bytes + (1 if use_resident else n_tiles) * NB * blk_w_bytes
    cost = pl.CostEstimate(
        flops=2 * Bp * Dp * H + NB * 16 * Bp * H * H,
        transcendentals=Bp * (NB + 1),   # one rsqrt per row per LayerNorm
        bytes_accessed=Bp * Dp * bpe_x + Bp * H * bpe_x + weight_read_bytes + small_bytes,
    )

    if use_resident:
        kernel = functools.partial(_residual_resident_kernel,
                                   compute_dtype=compute_dtype, num_blocks=NB)
        call = pl.pallas_call(
            kernel,
            out_shape=jax.ShapeDtypeStruct((Bp, H), x.dtype),
            grid_spec=pltpu.PrefetchScalarGridSpec(
                num_scalar_prefetch=0,
                grid=(n_tiles,),
                in_specs=[
                    pl.BlockSpec((tb, Dp), lambda i: (i, 0)),          # x
                    _const_spec((Dp, H), lambda i: (0, 0)),            # fc_w
                    _const_spec((1, H), lambda i: (0, 0)),             # fc_b
                    _const_spec((NB, 1, H), lambda i: (0, 0, 0)),      # ln_g
                    _const_spec((NB, 1, H), lambda i: (0, 0, 0)),      # ln_b
                    _const_spec((NB, H, 4 * H), lambda i: (0, 0, 0)),  # w1
                    _const_spec((NB, 1, 4 * H), lambda i: (0, 0, 0)),  # b1
                    _const_spec((NB, 4 * H, H), lambda i: (0, 0, 0)),  # w2
                    _const_spec((NB, 1, H), lambda i: (0, 0, 0)),      # b2
                    _const_spec((1, H), lambda i: (0, 0)),             # fin_g
                    _const_spec((1, H), lambda i: (0, 0)),             # fin_b
                ],
                out_specs=pl.BlockSpec((tb, H), lambda i: (i, 0)),
            ),
            compiler_params=pltpu.CompilerParams(
                dimension_semantics=("parallel",),
                vmem_limit_bytes=vmem_limit),
            cost_estimate=cost,
        )
    else:
        kernel = functools.partial(_residual_streamed_kernel, compute_dtype=compute_dtype)
        call = pl.pallas_call(
            kernel,
            out_shape=jax.ShapeDtypeStruct((Bp, H), x.dtype),
            grid_spec=pltpu.PrefetchScalarGridSpec(
                num_scalar_prefetch=0,
                # nb must remain the innermost, "arbitrary" axis (scratch carry).
                grid=(n_tiles, NB),
                in_specs=[
                    pl.BlockSpec((tb, Dp), lambda i, nb: (i, 0)),          # x
                    _const_spec((Dp, H), lambda i, nb: (0, 0)),            # fc_w
                    _const_spec((1, H), lambda i, nb: (0, 0)),             # fc_b
                    _const_spec((NB, 1, H), lambda i, nb: (0, 0, 0)),      # ln_g (resident)
                    _const_spec((NB, 1, H), lambda i, nb: (0, 0, 0)),      # ln_b (resident)
                    pl.BlockSpec((1, H, 4 * H), lambda i, nb: (nb, 0, 0)), # w1 (streamed)
                    _const_spec((NB, 1, 4 * H), lambda i, nb: (0, 0, 0)),  # b1 (resident)
                    pl.BlockSpec((1, 4 * H, H), lambda i, nb: (nb, 0, 0)), # w2 (streamed)
                    _const_spec((NB, 1, H), lambda i, nb: (0, 0, 0)),      # b2 (resident)
                    _const_spec((1, H), lambda i, nb: (0, 0)),             # fin_g
                    _const_spec((1, H), lambda i, nb: (0, 0)),             # fin_b
                ],
                out_specs=pl.BlockSpec((tb, H), lambda i, nb: (i, 0)),
                scratch_shapes=[pltpu.VMEM((tb, H), jnp.float32)],
            ),
            compiler_params=pltpu.CompilerParams(
                dimension_semantics=("parallel", "arbitrary"),
                vmem_limit_bytes=vmem_limit),
            cost_estimate=cost,
        )

    out = call(x_p, fc_w, fc_b, ln_g, ln_b, w1, b1, w2, b2, fin_g, fin_b)
    return out[:B] if Bp != B else out


def ppo_encoder_mlp(x, params, *, batch_tile=None, compute_dtype=jnp.bfloat16):
    """block_type == 'mlp': Linear(H,4H) -> ReLU -> Linear(4H,H) -> ReLU."""
    B, H = x.shape
    assert H % 128 == 0, "hidden_dim should be a multiple of 128 (lane width)"
    row = _batch_row_align(compute_dtype)
    tb = (_round_up(batch_tile, row) if batch_tile is not None
          else _pick_batch_tile(B, compute_dtype))

    bpe_w = jnp.dtype(compute_dtype).itemsize
    bpe_x = jnp.dtype(x.dtype).itemsize
    budget = _vmem_budget_bytes()

    def est(t):
        return (2 * 8 * H * H * bpe_w + 4 * 5 * H
                + 4 * t * H * bpe_x + t * 4 * H * 4 + t * H * 4 + (2 << 20))

    while est(tb) > budget and tb > row:
        tb = max(row, _round_up(tb // 2, row))
    # TODO(synk): chunk the 4*H dimension if the two weight matrices alone
    # exceed the VMEM budget (hidden_dim >~ 1500 bf16 on v7x).

    Bp = _round_up(B, tb)
    x_p = x if Bp == B else jnp.pad(x, ((0, Bp - B), (0, 0)))

    w1 = params["w1"].astype(compute_dtype)
    w2 = params["w2"].astype(compute_dtype)
    b1 = params["b1"].astype(jnp.float32)
    b2 = params["b2"].astype(jnp.float32)

    kernel = functools.partial(_mlp_encoder_kernel, compute_dtype=compute_dtype)
    vmem_limit = int(min(budget, max(est(tb), 32 << 20)))
    cost = pl.CostEstimate(
        flops=16 * Bp * H * H, transcendentals=0,
        bytes_accessed=2 * Bp * H * bpe_x + 8 * H * H * bpe_w + 5 * H * 4)

    out = pl.pallas_call(
        kernel,
        out_shape=jax.ShapeDtypeStruct((Bp, H), x.dtype),
        grid_spec=pltpu.PrefetchScalarGridSpec(
            num_scalar_prefetch=0,
            grid=(Bp // tb,),
            in_specs=[
                pl.BlockSpec((tb, H), lambda i: (i, 0)),
                _const_spec((H, 4 * H), lambda i: (0, 0)),
                _const_spec((1, 4 * H), lambda i: (0, 0)),
                _const_spec((4 * H, H), lambda i: (0, 0)),
                _const_spec((1, H), lambda i: (0, 0)),
            ],
            out_specs=pl.BlockSpec((tb, H), lambda i: (i, 0)),
        ),
        compiler_params=pltpu.CompilerParams(
            dimension_semantics=("parallel",),
            vmem_limit_bytes=vmem_limit),
        cost_estimate=cost,
    )(x_p, w1, b1, w2, b2)
    return out[:B] if Bp != B else out


# ----------------------------------------------------------------------------
# deterministic parameter construction (mirrors the module's __init__ shapes)
# ----------------------------------------------------------------------------
def init_residual_params(key, input_dim, hidden_dim, num_blocks, dtype=jnp.float32):
    H, D, NB = hidden_dim, input_dim, num_blocks
    keys = jax.random.split(key, 2 + 4 * NB)
    # fc: orthogonal(gain=1.0) weight, zero bias   (stored as [in, out])
    fc_w = jax.nn.initializers.orthogonal(scale=1.0)(keys[0], (D, H), dtype)
    fc_b = jnp.zeros((1, H), dtype)
    # ResidualBlocks: kaiming_normal(fan_in, relu) for fc1/fc2, small uniform
    # bias, LayerNorm gamma=1 / beta=0.
    w1_l, b1_l, w2_l, b2_l = [], [], [], []
    he = jax.nn.initializers.variance_scaling(2.0, "fan_in", "normal")
    for i in range(NB):
        k1, k2, k3, k4 = keys[2 + 4 * i: 6 + 4 * i]
        w1_l.append(he(k1, (H, 4 * H), dtype))
        b1_l.append(jax.random.uniform(k2, (1, 4 * H), dtype, -1.0, 1.0) / jnp.sqrt(H))
        w2_l.append(he(k3, (4 * H, H), dtype))
        b2_l.append(jax.random.uniform(k4, (1, H), dtype, -1.0, 1.0) / jnp.sqrt(4 * H))
    return {
        "fc_w": fc_w, "fc_b": fc_b,
        "ln_g": jnp.ones((NB, 1, H), dtype), "ln_b": jnp.zeros((NB, 1, H), dtype),
        "w1": jnp.stack(w1_l), "b1": jnp.stack(b1_l),
        "w2": jnp.stack(w2_l), "b2": jnp.stack(b2_l),
        "fin_g": jnp.ones((1, H), dtype), "fin_b": jnp.zeros((1, H), dtype),
    }


def init_mlp_params(key, hidden_dim, dtype=jnp.float32):
    H = hidden_dim
    k1, k2, k3, k4 = jax.random.split(key, 4)
    lim1 = 1.0 / jnp.sqrt(H)
    lim2 = 1.0 / jnp.sqrt(4 * H)
    return {
        "w1": jax.random.uniform(k1, (H, 4 * H), dtype, -lim1, lim1),
        "b1": jax.random.uniform(k2, (1, 4 * H), dtype, -lim1, lim1),
        "w2": jax.random.uniform(k3, (4 * H, H), dtype, -lim2, lim2),
        "b2": jax.random.uniform(k4, (1, H), dtype, -lim2, lim2),
    }


# ----------------------------------------------------------------------------
# pure-JAX references for correctness
# ----------------------------------------------------------------------------
def _ref_residual(x, p):
    h = x @ p["fc_w"] + p["fc_b"]
    for i in range(p["w1"].shape[0]):
        z = _layernorm(h, p["ln_g"][i], p["ln_b"][i])
        z = jnp.maximum(z @ p["w1"][i] + p["b1"][i], 0.0)
        z = z @ p["w2"][i] + p["b2"][i]
        h = h + z
    return _layernorm(h, p["fin_g"], p["fin_b"])


def _ref_mlp(x, p):
    h = jnp.maximum(x @ p["w1"] + p["b1"], 0.0)
    return jnp.maximum(h @ p["w2"] + p["b2"], 0.0)


if __name__ == "__main__":
    key = jax.random.PRNGKey(0)
    k_x, k_pr, k_x2, k_xm, k_pm = jax.random.split(key, 5)

    # --- residual path: PPOEncoder("residual", input_dim=32, num_blocks=2, hidden_dim=128)
    B, D, H, NB = 8, 32, 128, 2
    x_res = jax.random.normal(k_x, (B, D), jnp.float32)
    p_res = init_residual_params(k_pr, D, H, NB)
    ref_res = _ref_residual(x_res, p_res)

    # f32 matmuls: matches the PyTorch float32 module
    out_res = jax.block_until_ready(
        ppo_encoder_residual(x_res, p_res, compute_dtype=jnp.float32))
    assert out_res.shape == (B, H)
    assert jnp.max(jnp.abs(out_res - ref_res)) < 1e-4

    # default bf16 matmuls (fast path on v6e/v7x), f32 accumulate / LayerNorm
    out_bf16 = jax.block_until_ready(ppo_encoder_residual(x_res, p_res))
    assert out_bf16.shape == (B, H)
    assert bool(jnp.all(jnp.isfinite(out_bf16)))
    assert jnp.max(jnp.abs(out_bf16 - ref_res)) < 0.5  # loose: bf16 weights/matmuls

    # multiple batch tiles, forced streamed fallback (exercise the 2-D-grid carry)
    B2 = 24
    x_res2 = jax.random.normal(k_x2, (B2, D), jnp.float32)
    ref_res2 = _ref_residual(x_res2, p_res)
    out_str = jax.block_until_ready(
        ppo_encoder_residual(x_res2, p_res, compute_dtype=jnp.float32,
                             batch_tile=8, weights_resident=False))
    assert out_str.shape == (B2, H)
    assert jnp.max(jnp.abs(out_str - ref_res2)) < 1e-4

    # resident (default) structure with multiple batch tiles
    out_res2 = jax.block_until_ready(
        ppo_encoder_residual(x_res2, p_res, compute_dtype=jnp.float32, batch_tile=16))
    assert out_res2.shape == (B2, H)
    assert jnp.max(jnp.abs(out_res2 - ref_res2)) < 1e-4

    # --- mlp path: PPOEncoder("mlp", input_dim=H, hidden_dim=128)
    x_mlp = jax.random.normal(k_xm, (B, H), jnp.float32)
    p_mlp = init_mlp_params(k_pm, H)
    ref_mlp = _ref_mlp(x_mlp, p_mlp)
    out_mlp = jax.block_until_ready(
        ppo_encoder_mlp(x_mlp, p_mlp, compute_dtype=jnp.float32))
    assert out_mlp.shape == (B, H)
    assert jnp.max(jnp.abs(out_mlp - ref_mlp)) < 1e-4

    print("KERNEL_OK")
</pallas_src>

<mosaic_0001>
module attributes {stable_mosaic.version = 11 : i64} {
  func.func @_probe(%arg0: i32, %arg1: memref<8x128xf32, #tpu.memory_space<vmem>>, %arg2: memref<8x128xf32, #tpu.memory_space<vmem>>, %arg3: memref<8x128xf32, #tpu.memory_space<vmem>>) attributes {dimension_semantics = [#tpu.dimension_semantics<arbitrary>], iteration_bounds = array<i64: 1>, scalar_prefetch = 0 : i64, scratch_operands = 0 : i64, tpu.core_type = #tpu.core_type<tc>, window_params = [{pipeline_mode = #tpu.pipeline_mode<synchronous>, transform_indices = @transform_0, window_bounds = array<i64: 8, 128>}, {pipeline_mode = #tpu.pipeline_mode<synchronous>, transform_indices = @transform_1, window_bounds = array<i64: 8, 128>}, {pipeline_mode = #tpu.pipeline_mode<synchronous>, transform_indices = @transform_2, window_bounds = array<i64: 8, 128>}]} {
    %c0 = arith.constant 0 : index
    %c0_0 = arith.constant 0 : index
    %0 = vector.load %arg1[%c0, %c0_0] : memref<8x128xf32, #tpu.memory_space<vmem>>, vector<8x128xf32>
    %c0_1 = arith.constant 0 : index
    %c0_2 = arith.constant 0 : index
    %1 = vector.load %arg2[%c0_1, %c0_2] : memref<8x128xf32, #tpu.memory_space<vmem>>, vector<8x128xf32>
    %2 = arith.addf %0, %1 : vector<8x128xf32>
    %c0_3 = arith.constant 0 : index
    %c0_4 = arith.constant 0 : index
    %3 = vector.load %arg3[%c0_3, %c0_4] : memref<8x128xf32, #tpu.memory_space<vmem>>, vector<8x128xf32>
    tpu.vector_store %arg3[%c0_3, %c0_4], %2 {strides = array<i32>} : memref<8x128xf32, #tpu.memory_space<vmem>>, vector<8x128xf32>,
    return
  }
  func.func @transform_0(%arg0: i32) -> (i32, i32) {
    %c0_i32 = arith.constant 0 : i32
    %c0_i32_0 = arith.constant 0 : i32
    %c0_i32_1 = arith.constant 0 : i32
    return %c0_i32, %c0_i32_0 : i32, i32
  }
  func.func @transform_1(%arg0: i32) -> (i32, i32) {
    %c0_i32 = arith.constant 0 : i32
    %c0_i32_0 = arith.constant 0 : i32
    %c0_i32_1 = arith.constant 0 : i32
    return %c0_i32, %c0_i32_0 : i32, i32
  }
  func.func @transform_2(%arg0: i32) -> (i32, i32) {
    %c0_i32 = arith.constant 0 : i32
    %c0_i32_0 = arith.constant 0 : i32
    %c0_i32_1 = arith.constant 0 : i32
    return %c0_i32, %c0_i32_0 : i32, i32
  }
}

module attributes {stable_mosaic.version = 11 : i64} {
  func.func @_residual_resident_kernel(%arg0: i32, %arg1: memref<8x128xf32, #tpu.memory_space<vmem>>, %arg2: memref<128x128xf32, #tpu.memory_space<vmem>>, %arg3: memref<1x128xf32, #tpu.memory_space<vmem>>, %arg4: memref<2x1x128xf32, #tpu.memory_space<vmem>>, %arg5: memref<2x1x128xf32, #tpu.memory_space<vmem>>, %arg6: memref<2x128x512xf32, #tpu.memory_space<vmem>>, %arg7: memref<2x1x512xf32, #tpu.memory_space<vmem>>, %arg8: memref<2x512x128xf32, #tpu.memory_space<vmem>>, %arg9: memref<2x1x128xf32, #tpu.memory_space<vmem>>, %arg10: memref<1x128xf32, #tpu.memory_space<vmem>>, %arg11: memref<1x128xf32, #tpu.memory_space<vmem>>, %arg12: memref<8x128xf32, #tpu.memory_space<vmem>>) attributes {dimension_semantics = [#tpu.dimension_semantics<parallel>], iteration_bounds = array<i64: 1>, scalar_prefetch = 0 : i64, scratch_operands = 0 : i64, tpu.core_type = #tpu.core_type<tc>, window_params = [{transform_indices = @transform_0, window_bounds = array<i64: 8, 128>}, {pipeline_mode = #tpu.pipeline_mode<synchronous>, transform_indices = @transform_1, window_bounds = array<i64: 128, 128>}, {pipeline_mode = #tpu.pipeline_mode<synchronous>, transform_indices = @transform_2, window_bounds = array<i64: 1, 128>}, {pipeline_mode = #tpu.pipeline_mode<synchronous>, transform_indices = @transform_3, window_bounds = array<i64: 2, 1, 128>}, {pipeline_mode = #tpu.pipeline_mode<synchronous>, transform_indices = @transform_4, window_bounds = array<i64: 2, 1, 128>}, {pipeline_mode = #tpu.pipeline_mode<synchronous>, transform_indices = @transform_5, window_bounds = array<i64: 2, 128, 512>}, {pipeline_mode = #tpu.pipeline_mode<synchronous>, transform_indices = @transform_6, window_bounds = array<i64: 2, 1, 512>}, {pipeline_mode = #tpu.pipeline_mode<synchronous>, transform_indices = @transform_7, window_bounds = array<i64: 2, 512, 128>}, {pipeline_mode = #tpu.pipeline_mode<synchronous>, transform_indices = @transform_8, window_bounds = array<i64: 2, 1, 128>}, {pipeline_mode = #tpu.pipeline_mode<synchronous>, transform_indices = @transform_9, window_bounds = array<i64: 1, 128>}, {pipeline_mode = #tpu.pipeline_mode<synchronous>, transform_indices = @transform_10, window_bounds = array<i64: 1, 128>}, {transform_indices = @transform_11, window_bounds = array<i64: 8, 128>}]} {
    %c0 = arith.constant 0 : index
    %c0_0 = arith.constant 0 : index
    %0 = vector.load %arg1[%c0, %c0_0] : memref<8x128xf32, #tpu.memory_space<vmem>>, vector<8x128xf32>
    %c0_1 = arith.constant 0 : index
    %c0_2 = arith.constant 0 : index
    %1 = vector.load %arg2[%c0_1, %c0_2] : memref<128x128xf32, #tpu.memory_space<vmem>>, vector<128x128xf32>
    %cst = arith.constant dense<0.000000e+00> : vector<8x128xf32>
    %2 = tpu.matmul %0, %1, %cst {dimension_numbers = #tpu.dot_dimension_numbers<[1], [0], [0], [1], [0, 0, 1, 1], [], []>} : vector<8x128xf32>, vector<128x128xf32>, vector<8x128xf32> -> vector<8x128xf32>
    %c0_3 = arith.constant 0 : index
    %c0_4 = arith.constant 0 : index
    %3 = vector.load %arg3[%c0_3, %c0_4] : memref<1x128xf32, #tpu.memory_space<vmem>>, vector<1x128xf32>
    %4 = vector.broadcast %3 : vector<1x128xf32> to vector<8x128xf32>
    %5 = arith.addf %2, %4 : vector<8x128xf32>
    %c0_5 = arith.constant 0 : index
    %c0_6 = arith.constant 0 : index
    %c0_7 = arith.constant 0 : index
    %6 = vector.load %arg4[%c0_5, %c0_6, %c0_7] : memref<2x1x128xf32, #tpu.memory_space<vmem>>, vector<1x1x128xf32>
    %7 = vector.shape_cast %6 : vector<1x1x128xf32> to vector<1x128xf32>
    %c0_8 = arith.constant 0 : index
    %c0_9 = arith.constant 0 : index
    %c0_10 = arith.constant 0 : index
    %8 = vector.load %arg5[%c0_8, %c0_9, %c0_10] : memref<2x1x128xf32, #tpu.memory_space<vmem>>, vector<1x1x128xf32>
    %9 = vector.shape_cast %8 : vector<1x1x128xf32> to vector<1x128xf32>
    %cst_11 = arith.constant dense<0.000000e+00> : vector<8xf32>
    %10 = vector.multi_reduction <add>, %5, %cst_11 [1] : vector<8x128xf32> to vector<8xf32>
    %11 = vector.shape_cast %10 : vector<8xf32> to vector<8x1xf32>
    %cst_12 = arith.constant 1.280000e+02 : f32
    %12 = vector.broadcast %cst_12 : f32 to vector<8x1xf32>
    %13 = arith.divf %11, %12 : vector<8x1xf32>
    %14 = vector.broadcast %13 : vector<8x1xf32> to vector<8x128xf32>
    %15 = arith.subf %5, %14 : vector<8x128xf32>
    %16 = arith.mulf %15, %15 : vector<8x128xf32>
    %cst_13 = arith.constant dense<0.000000e+00> : vector<8xf32>
    %17 = vector.multi_reduction <add>, %16, %cst_13 [1] : vector<8x128xf32> to vector<8xf32>
    %18 = vector.shape_cast %17 : vector<8xf32> to vector<8x1xf32>
    %cst_14 = arith.constant 1.280000e+02 : f32
    %19 = vector.broadcast %cst_14 : f32 to vector<8x1xf32>
    %20 = arith.divf %18, %19 : vector<8x1xf32>
    %21 = vector.broadcast %13 : vector<8x1xf32> to vector<8x128xf32>
    %22 = arith.subf %5, %21 : vector<8x128xf32>
    %cst_15 = arith.constant 9.99999974E-6 : f32
    %23 = vector.broadcast %cst_15 : f32 to vector<8x1xf32>
    %24 = arith.addf %20, %23 : vector<8x1xf32>
    %25 = math.rsqrt %24 : vector<8x1xf32>
    %26 = vector.broadcast %25 : vector<8x1xf32> to vector<8x128xf32>
    %27 = arith.mulf %22, %26 : vector<8x128xf32>
    %28 = vector.broadcast %7 : vector<1x128xf32> to vector<8x128xf32>
    %29 = arith.mulf %27, %28 : vector<8x128xf32>
    %30 = vector.broadcast %9 : vector<1x128xf32> to vector<8x128xf32>
    %31 = arith.addf %29, %30 : vector<8x128xf32>
    %c0_16 = arith.constant 0 : index
    %c0_17 = arith.constant 0 : index
    %c0_18 = arith.constant 0 : index
    %32 = vector.load %arg6[%c0_16, %c0_17, %c0_18] : memref<2x128x512xf32, #tpu.memory_space<vmem>>, vector<1x128x512xf32>
    %33 = vector.shape_cast %32 : vector<1x128x512xf32> to vector<128x512xf32>
    %cst_19 = arith.constant dense<0.000000e+00> : vector<8x512xf32>
    %34 = tpu.matmul %31, %33, %cst_19 {dimension_numbers = #tpu.dot_dimension_numbers<[1], [0], [0], [1], [0, 0, 1, 1], [], []>} : vector<8x128xf32>, vector<128x512xf32>, vector<8x512xf32> -> vector<8x512xf32>
    %c0_20 = arith.constant 0 : index
    %c0_21 = arith.constant 0 : index
    %c0_22 = arith.constant 0 : index
    %35 = vector.load %arg7[%c0_20, %c0_21, %c0_22] : memref<2x1x512xf32, #tpu.memory_space<vmem>>, vector<1x1x512xf32>
    %36 = vector.shape_cast %35 : vector<1x1x512xf32> to vector<1x512xf32>
    %37 = vector.broadcast %36 : vector<1x512xf32> to vector<8x512xf32>
    %38 = arith.addf %34, %37 : vector<8x512xf32>
    %cst_23 = arith.constant 0.000000e+00 : f32
    %39 = vector.broadcast %cst_23 : f32 to vector<8x512xf32>
    %40 = arith.maximumf %38, %39 : vector<8x512xf32>
    %c0_24 = arith.constant 0 : index
    %c0_25 = arith.constant 0 : index
    %c0_26 = arith.constant 0 : index
    %41 = vector.load %arg8[%c0_24, %c0_25, %c0_26] : memref<2x512x128xf32, #tpu.memory_space<vmem>>, vector<1x512x128xf32>
    %42 = vector.shape_cast %41 : vector<1x512x128xf32> to vector<512x128xf32>
    %cst_27 = arith.constant dense<0.000000e+00> : vector<8x128xf32>
    %43 = tpu.matmul %40, %42, %cst_27 {dimension_numbers = #tpu.dot_dimension_numbers<[1], [0], [0], [1], [0, 0, 1, 1], [], []>} : vector<8x512xf32>, vector<512x128xf32>, vector<8x128xf32> -> vector<8x128xf32>
    %c0_28 = arith.constant 0 : index
    %c0_29 = arith.constant 0 : index
    %c0_30 = arith.constant 0 : index
    %44 = vector.load %arg9[%c0_28, %c0_29, %c0_30] : memref<2x1x128xf32, #tpu.memory_space<vmem>>, vector<1x1x128xf32>
    %45 = vector.shape_cast %44 : vector<1x1x128xf32> to vector<1x128xf32>
    %46 = vector.broadcast %45 : vector<1x128xf32> to vector<8x128xf32>
    %47 = arith.addf %43, %46 : vector<8x128xf32>
    %48 = arith.addf %5, %47 : vector<8x128xf32>
    %c1 = arith.constant 1 : index
    %c0_31 = arith.constant 0 : index
    %c0_32 = arith.constant 0 : index
    %49 = vector.load %arg4[%c1, %c0_31, %c0_32] : memref<2x1x128xf32, #tpu.memory_space<vmem>>, vector<1x1x128xf32>
    %50 = vector.shape_cast %49 : vector<1x1x128xf32> to vector<1x128xf32>
    %c1_33 = arith.constant 1 : index
    %c0_34 = arith.constant 0 : index
    %c0_35 = arith.constant 0 : index
    %51 = vector.load %arg5[%c1_33, %c0_34, %c0_35] : memref<2x1x128xf32, #tpu.memory_space<vmem>>, vector<1x1x128xf32>
    %52 = vector.shape_cast %51 : vector<1x1x128xf32> to vector<1x128xf32>
    %cst_36 = arith.constant dense<0.000000e+00> : vector<8xf32>
    %53 = vector.multi_reduction <add>, %48, %cst_36 [1] : vector<8x128xf32> to vector<8xf32>
    %54 = vector.shape_cast %53 : vector<8xf32> to vector<8x1xf32>
    %cst_37 = arith.constant 1.280000e+02 : f32
    %55 = vector.broadcast %cst_37 : f32 to vector<8x1xf32>
    %56 = arith.divf %54, %55 : vector<8x1xf32>
    %57 = vector.broadcast %56 : vector<8x1xf32> to vector<8x128xf32>
    %58 = arith.subf %48, %57 : vector<8x128xf32>
    %59 = arith.mulf %58, %58 : vector<8x128xf32>
    %cst_38 = arith.constant dense<0.000000e+00> : vector<8xf32>
    %60 = vector.multi_reduction <add>, %59, %cst_38 [1] : vector<8x128xf32> to vector<8xf32>
    %61 = vector.shape_cast %60 : vector<8xf32> to vector<8x1xf32>
    %cst_39 = arith.constant 1.280000e+02 : f32
    %62 = vector.broadcast %cst_39 : f32 to vector<8x1xf32>
    %63 = arith.divf %61, %62 : vector<8x1xf32>
    %64 = vector.broadcast %56 : vector<8x1xf32> to vector<8x128xf32>
    %65 = arith.subf %48, %64 : vector<8x128xf32>
    %cst_40 = arith.constant 9.99999974E-6 : f32
    %66 = vector.broadcast %cst_40 : f32 to vector<8x1xf32>
    %67 = arith.addf %63, %66 : vector<8x1xf32>
    %68 = math.rsqrt %67 : vector<8x1xf32>
    %69 = vector.broadcast %68 : vector<8x1xf32> to vector<8x128xf32>
    %70 = arith.mulf %65, %69 : vector<8x128xf32>
    %71 = vector.broadcast %50 : vector<1x128xf32> to vector<8x128xf32>
    %72 = arith.mulf %70, %71 : vector<8x128xf32>
    %73 = vector.broadcast %52 : vector<1x128xf32> to vector<8x128xf32>
    %74 = arith.addf %72, %73 : vector<8x128xf32>
    %c1_41 = arith.constant 1 : index
    %c0_42 = arith.constant 0 : index
    %c0_43 = arith.constant 0 : index
    %75 = vector.load %arg6[%c1_41, %c0_42, %c0_43] : memref<2x128x512xf32, #tpu.memory_space<vmem>>, vector<1x128x512xf32>
    %76 = vector.shape_cast %75 : vector<1x128x512xf32> to vector<128x512xf32>
    %cst_44 = arith.constant dense<0.000000e+00> : vector<8x512xf32>
    %77 = tpu.matmul %74, %76, %cst_44 {dimension_numbers = #tpu.dot_dimension_numbers<[1], [0], [0], [1], [0, 0, 1, 1], [], []>} : vector<8x128xf32>, vector<128x512xf32>, vector<8x512xf32> -> vector<8x512xf32>
    %c1_45 = arith.constant 1 : index
    %c0_46 = arith.constant 0 : index
    %c0_47 = arith.constant 0 : index
    %78 = vector.load %arg7[%c1_45, %c0_46, %c0_47] : memref<2x1x512xf32, #tpu.memory_space<vmem>>, vector<1x1x512xf32>
    %79 = vector.shape_cast %78 : vector<1x1x512xf32> to vector<1x512xf32>
    %80 = vector.broadcast %79 : vector<1x512xf32> to vector<8x512xf32>
    %81 = arith.addf %77, %80 : vector<8x512xf32>
    %cst_48 = arith.constant 0.000000e+00 : f32
    %82 = vector.broadcast %cst_48 : f32 to vector<8x512xf32>
    %83 = arith.maximumf %81, %82 : vector<8x512xf32>
    %c1_49 = arith.constant 1 : index
    %c0_50 = arith.constant 0 : index
    %c0_51 = arith.constant 0 : index
    %84 = vector.load %arg8[%c1_49, %c0_50, %c0_51] : memref<2x512x128xf32, #tpu.memory_space<vmem>>, vector<1x512x128xf32>
    %85 = vector.shape_cast %84 : vector<1x512x128xf32> to vector<512x128xf32>
    %cst_52 = arith.constant dense<0.000000e+00> : vector<8x128xf32>
    %86 = tpu.matmul %83, %85, %cst_52 {dimension_numbers = #tpu.dot_dimension_numbers<[1], [0], [0], [1], [0, 0, 1, 1], [], []>} : vector<8x512xf32>, vector<512x128xf32>, vector<8x128xf32> -> vector<8x128xf32>
    %c1_53 = arith.constant 1 : index
    %c0_54 = arith.constant 0 : index
    %c0_55 = arith.constant 0 : index
    %87 = vector.load %arg9[%c1_53, %c0_54, %c0_55] : memref<2x1x128xf32, #tpu.memory_space<vmem>>, vector<1x1x128xf32>
    %88 = vector.shape_cast %87 : vector<1x1x128xf32> to vector<1x128xf32>
    %89 = vector.broadcast %88 : vector<1x128xf32> to vector<8x128xf32>
    %90 = arith.addf %86, %89 : vector<8x128xf32>
    %91 = arith.addf %48, %90 : vector<8x128xf32>
    %c0_56 = arith.constant 0 : index
    %c0_57 = arith.constant 0 : index
    %92 = vector.load %arg10[%c0_56, %c0_57] : memref<1x128xf32, #tpu.memory_space<vmem>>, vector<1x128xf32>
    %c0_58 = arith.constant 0 : index
    %c0_59 = arith.constant 0 : index
    %93 = vector.load %arg11[%c0_58, %c0_59] : memref<1x128xf32, #tpu.memory_space<vmem>>, vector<1x128xf32>
    %cst_60 = arith.constant dense<0.000000e+00> : vector<8xf32>
    %94 = vector.multi_reduction <add>, %91, %cst_60 [1] : vector<8x128xf32> to vector<8xf32>
    %95 = vector.shape_cast %94 : vector<8xf32> to vector<8x1xf32>
    %cst_61 = arith.constant 1.280000e+02 : f32
    %96 = vector.broadcast %cst_61 : f32 to vector<8x1xf32>
    %97 = arith.divf %95, %96 : vector<8x1xf32>
    %98 = vector.broadcast %97 : vector<8x1xf32> to vector<8x128xf32>
    %99 = arith.subf %91, %98 : vector<8x128xf32>
    %100 = arith.mulf %99, %99 : vector<8x128xf32>
    %cst_62 = arith.constant dense<0.000000e+00> : vector<8xf32>
    %101 = vector.multi_reduction <add>, %100, %cst_62 [1] : vector<8x128xf32> to vector<8xf32>
    %102 = vector.shape_cast %101 : vector<8xf32> to vector<8x1xf32>
    %cst_63 = arith.constant 1.280000e+02 : f32
    %103 = vector.broadcast %cst_63 : f32 to vector<8x1xf32>
    %104 = arith.divf %102, %103 : vector<8x1xf32>
    %105 = vector.broadcast %97 : vector<8x1xf32> to vector<8x128xf32>
    %106 = arith.subf %91, %105 : vector<8x128xf32>
    %cst_64 = arith.constant 9.99999974E-6 : f32
    %107 = vector.broadcast %cst_64 : f32 to vector<8x1xf32>
    %108 = arith.addf %104, %107 : vector<8x1xf32>
    %109 = math.rsqrt %108 : vector<8x1xf32>
    %110 = vector.broadcast %109 : vector<8x1xf32> to vector<8x128xf32>
    %111 = arith.mulf %106, %110 : vector<8x128xf32>
    %112 = vector.broadcast %92 : vector<1x128xf32> to vector<8x128xf32>
    %113 = arith.mulf %111, %112 : vector<8x128xf32>
    %114 = vector.broadcast %93 : vector<1x128xf32> to vector<8x128xf32>
    %115 = arith.addf %113, %114 : vector<8x128xf32>
    %c0_65 = arith.constant 0 : index
    %c0_66 = arith.constant 0 : index
    %116 = vector.load %arg12[%c0_65, %c0_66] : memref<8x128xf32, #tpu.memory_space<vmem>>, vector<8x128xf32>
    tpu.vector_store %arg12[%c0_65, %c0_66], %115 {strides = array<i32>} : memref<8x128xf32, #tpu.memory_space<vmem>>, vector<8x128xf32>,
    return
  }
  func.func @transform_0(%arg0: i32) -> (i32, i32) {
    %c0_i32 = arith.constant 0 : i32
    %c0_i32_0 = arith.constant 0 : i32
    return %arg0, %c0_i32 : i32, i32
  }
  func.func @transform_1(%arg0: i32) -> (i32, i32) {
    %c0_i32 = arith.constant 0 : i32
    %c0_i32_0 = arith.constant 0 : i32
    %c0_i32_1 = arith.constant 0 : i32
    return %c0_i32, %c0_i32_0 : i32, i32
  }
  func.func @transform_2(%arg0: i32) -> (i32, i32) {
    %c0_i32 = arith.constant 0 : i32
    %c0_i32_0 = arith.constant 0 : i32
    %c0_i32_1 = arith.constant 0 : i32
    return %c0_i32, %c0_i32_0 : i32, i32
  }
  func.func @transform_3(%arg0: i32) -> (i32, i32, i32) {
    %c0_i32 = arith.constant 0 : i32
    %c0_i32_0 = arith.constant 0 : i32
    %c0_i32_1 = arith.constant 0 : i32
    %c0_i32_2 = arith.constant 0 : i32
    return %c0_i32, %c0_i32_0, %c0_i32_1 : i32, i32, i32
  }
  func.func @transform_4(%arg0: i32) -> (i32, i32, i32) {
    %c0_i32 = arith.constant 0 : i32
    %c0_i32_0 = arith.constant 0 : i32
    %c0_i32_1 = arith.constant 0 : i32
    %c0_i32_2 = arith.constant 0 : i32
    return %c0_i32, %c0_i32_0, %c0_i32_1 : i32, i32, i32
  }
  func.func @transform_5(%arg0: i32) -> (i32, i32, i32) {
    %c0_i32 = arith.constant 0 : i32
    %c0_i32_0 = arith.constant 0 : i32
    %c0_i32_1 = arith.constant 0 : i32
    %c0_i32_2 = arith.constant 0 : i32
    return %c0_i32, %c0_i32_0, %c0_i32_1 : i32, i32, i32
  }
  func.func @transform_6(%arg0: i32) -> (i32, i32, i32) {
    %c0_i32 = arith.constant 0 : i32
    %c0_i32_0 = arith.constant 0 : i32
    %c0_i32_1 = arith.constant 0 : i32
    %c0_i32_2 = arith.constant 0 : i32
    return %c0_i32, %c0_i32_0, %c0_i32_1 : i32, i32, i32
  }
  func.func @transform_7(%arg0: i32) -> (i32, i32, i32) {
    %c0_i32 = arith.constant 0 : i32
    %c0_i32_0 = arith.constant 0 : i32
    %c0_i32_1 = arith.constant 0 : i32
    %c0_i32_2 = arith.constant 0 : i32
    return %c0_i32, %c0_i32_0, %c0_i32_1 : i32, i32, i32
  }
  func.func @transform_8(%arg0: i32) -> (i32, i32, i32) {
    %c0_i32 = arith.constant 0 : i32
    %c0_i32_0 = arith.constant 0 : i32
    %c0_i32_1 = arith.constant 0 : i32
    %c0_i32_2 = arith.constant 0 : i32
    return %c0_i32, %c0_i32_0, %c0_i32_1 : i32, i32, i32
  }
  func.func @transform_9(%arg0: i32) -> (i32, i32) {
    %c0_i32 = arith.constant 0 : i32
    %c0_i32_0 = arith.constant 0 : i32
    %c0_i32_1 = arith.constant 0 : i32
    return %c0_i32, %c0_i32_0 : i32, i32
  }
  func.func @transform_10(%arg0: i32) -> (i32, i32) {
    %c0_i32 = arith.constant 0 : i32
    %c0_i32_0 = arith.constant 0 : i32
    %c0_i32_1 = arith.constant 0 : i32
    return %c0_i32, %c0_i32_0 : i32, i32
  }
  func.func @transform_11(%arg0: i32) -> (i32, i32) {
    %c0_i32 = arith.constant 0 : i32
    %c0_i32_0 = arith.constant 0 : i32
    return %arg0, %c0_i32 : i32, i32
  }
}

</mosaic_0001>

<bundles_post_ra>
// kernel: tpu_custom_call.1
= control target key start
LH: loop header
LB: loop body
LE: loop exit
PB: predicated region body
PF: predicated region fallthrough
CT: control target
= control target key end

     0   :  { %7 = vsyncpa [#allocation3], 0  ;;  %s152_s0 = inlined_call_operand.hbm [shape: f32[8,128], index: 0, kind: input, shape index: {}]   ;;  %s153_s1 = inlined_call_operand.hbm [shape: f32[8,128], index: 1, kind: input, shape index: {}]   ;;  %s154_s2 = inlined_call_operand.hbm [shape: f32[8,128], index: 2, kind: output, shape index: {}]  }
   0x1   :  { %8 = vsyncpa [#allocation6], 0 }
   0x2   :  { %9 = vsyncpa [#allocation4], 0  ;;  %s125_s9 = smov [#allocation2]   ;;  %s126_s11 = smov [#allocation5]  }
   0x3   :  { %s16_s10 = sshll.u32 %s125_s9, 4  ;;  %s26_s12 = sshll.u32 %s126_s11, 4  ;;  %s17_s10 = int_to_ptr.vmem [resolvable:$true] %s16_s10  ;;  %s27_s12 = int_to_ptr.vmem [resolvable:$true] %s26_s12 }
   0x4   :  { %s67_s13 = scalar_lea.vmem %s17_s10, 128  ;;  %p72_p1 = scmp.lt.s32.totalorder %s17_s10, %s17_s10 }
   0x5   :  { %p68_p0 = scmp.ne.s32.totalorder %s17_s10, %s67_s13  ;;  %p73_p2 = scmp.lt.s32.totalorder %s67_s13, %s67_s13 }
   0x7   :  { %p74_p3 = por %p73_p2, %p72_p1 }
   0x9   :  { %p75_p4 = pnand %p74_p3, %p68_p0 }
   0xb   :  { %78 = shalt.err (!%p75_p4)
}
   0xc   :  { %19 = dma.hbm_to_vmem [thread:$0]  %s152_s0, 128, %s17_s10, [#allocation3]  }
   0xd   :  { %s87_s16 = scalar_lea.vmem %s27_s12, 128  ;;  %p92_p6 = scmp.lt.s32.totalorder %s27_s12, %s27_s12 }
   0xe   :  { %p88_p5 = scmp.ne.s32.totalorder %s27_s12, %s87_s16  ;;  %p93_p7 = scmp.lt.s32.totalorder %s87_s16, %s87_s16 }
  0x10   :  { %p94_p8 = por %p93_p7, %p92_p6 }
  0x12   :  { %p95_p9 = pnand %p94_p8, %p88_p5 }
  0x14   :  { %98 = shalt.err (!%p95_p9)
}
  0x15   :  { %29 = dma.hbm_to_vmem [thread:$0]  %s153_s1, 128, %s27_s12, [#allocation6]  }
  0x16   :  { %119 = dma.done.wait [#allocation3], 128  }
  0x17   :  { %120 = vsyncadd [#allocation3], 4294967168 }
  0x18   :  { %121 = dma.done.wait [#allocation6], 128  }
  0x19   :  { %122 = vsyncadd [#allocation6], 4294967168  ;;  %s127_s19 = smov [#allocation7]   ;;  %v36_v0 = vld [vmem:[#allocation2] sm:$0xff]  ;;  %v37_v1 = vld [vmem:[#allocation5] sm:$0xff] }
  0x1a   :  { %s46_s20 = sshll.u32 %s127_s19, 4  ;;  %v38_v2 = vadd.f32 %v37_v1, %v36_v0  ;;  %s47_s20 = int_to_ptr.vmem [resolvable:$true] %s46_s20 }
  0x1b   :  { %s99_s0 = scalar_lea.vmem %s47_s20, 128  ;;  %p104_p11 = scmp.lt.s32.totalorder %s47_s20, %s47_s20 }
  0x1c   :  { %39 = vst [vmem:[#allocation7] sm:$0xff] %v38_v2  ;;  %p100_p10 = scmp.ne.s32.totalorder %s47_s20, %s99_s0  ;;  %p105_p12 = scmp.lt.s32.totalorder %s99_s0, %s99_s0 }
  0x1e   :  { %p106_p13 = por %p105_p12, %p104_p11 }
  0x20   :  { %p107_p0 = pnand %p106_p13, %p100_p10 }
  0x22   :  { %110 = shalt.err (!%p107_p0)
}
  0x23   :  { %49 = dma.vmem_to_hbm [thread:$0]  %s47_s20, 128, %s154_s2, [#allocation4]  }
  0x24   :  { %123 = dma.done.wait [#allocation4], 128  }
  0x25   :  { %124 = vsyncadd [#allocation4], 4294967168 }
  0x26   :  { %53 = vsyncpa [#allocation3], 1 }
  0x27   :  { %54 = vsyncpa [#allocation6], 1 }
  0x28   :  { %55 = vsyncpa [#allocation4], 1 }

// kernel: tpu_custom_call.1
= control target key start
LH: loop header
LB: loop body
LE: loop exit
PB: predicated region body
PF: predicated region fallthrough
CT: control target
= control target key end

     0   :  { %16 = vsyncpa [#allocation3], 0  ;;  %s1770_s0 = inlined_call_operand.hbm [shape: f32[8,128], index: 0, kind: input, shape index: {}]   ;;  %s1771_s1 = inlined_call_operand.hbm [shape: f32[128,128], index: 1, kind: input, shape index: {}]   ;;  %s1772_s2 = inlined_call_operand.hbm [shape: f32[1,128], index: 2, kind: input, shape index: {}]   ;;  %s1773_s3 = inlined_call_operand.vmem [shape: f32[2,1,128], index: 3, kind: input, shape index: {}]   ;;  %s1774_s4 = inlined_call_operand.hbm [shape: f32[2,1,128], index: 4, kind: input, shape index: {}]   ;;  %s1775_s5 = inlined_call_operand.hbm [shape: f32[2,128,512], index: 5, kind: input, shape index: {}]   ;;  %s1776_s6 = inlined_call_operand.vmem [shape: f32[2,1,512], index: 6, kind: input, shape index: {}]   ;;  %s1777_s7 = inlined_call_operand.hbm [shape: f32[2,512,128], index: 7, kind: input, shape index: {}]   ;;  %s1778_s8 = inlined_call_operand.vmem [shape: f32[2,1,128], index: 8, kind: input, shape index: {}]   ;;  %s1779_s9 = inlined_call_operand.vmem [shape: f32[1,128], index: 9, kind: input, shape index: {}]   ;;  %s1780_s10 = inlined_call_operand.vmem [shape: f32[1,128], index: 10, kind: input, shape index: {}]   ;;  %s1781_s11 = inlined_call_operand.hbm [shape: f32[8,128], index: 11, kind: output, shape index: {}]  }
   0x1   :  { %17 = vsyncpa [#allocation6], 0 }
   0x2   :  { %18 = vsyncpa [#allocation9], 0 }
   0x3   :  { %19 = vsyncpa [#allocation12], 0 }
   0x4   :  { %20 = vsyncpa [#allocation4], 0  ;;  %s1581_s17 = smov [#allocation5]  }
   0x5   :  { %s36_s18 = sshll.u32 %s1581_s17, 4  ;;  %s37_s18 = int_to_ptr.vmem [resolvable:$true] %s36_s18 }
   0x6   :  { %s1439_s19 = scalar_lea.vmem %s37_s18, 2048  ;;  %p1444_p1 = scmp.lt.s32.totalorder %s37_s18, %s37_s18 }
   0x7   :  { %p1440_p0 = scmp.ne.s32.totalorder %s37_s18, %s1439_s19  ;;  %p1445_p2 = scmp.lt.s32.totalorder %s1439_s19, %s1439_s19 }
   0x9   :  { %p1446_p3 = por %p1445_p2, %p1444_p1 }
   0xb   :  { %p1447_p4 = pnand %p1446_p3, %p1440_p0 }
   0xd   :  { %1450 = shalt.err (!%p1447_p4)
}
   0xe   :  { %s1582_s20 = smov 128   ;;  %s1583_s21 = smov 8  }
   0xf   :  { %42 = dma.hbm_to_vmem [thread:$0]  %s1771_s1, 2048, %s37_s18, [#allocation6], %s1582_s20, %s1582_s20, %s1583_s21  }
  0x10   :  { %s1584_s24 = smov [#allocation8]  }
  0x11   :  { %s60_s25 = sshll.u32 %s1584_s24, 4  ;;  %s61_s25 = int_to_ptr.vmem [resolvable:$true] %s60_s25 }
  0x12   :  { %s1459_s26 = scalar_lea.vmem %s61_s25, 32  ;;  %p1464_p6 = scmp.lt.s32.totalorder %s61_s25, %s61_s25 }
  0x13   :  { %p1460_p5 = scmp.ne.s32.totalorder %s61_s25, %s1459_s26  ;;  %p1465_p7 = scmp.lt.s32.totalorder %s1459_s26, %s1459_s26 }
  0x15   :  { %p1466_p8 = por %p1465_p7, %p1464_p6 }
  0x17   :  { %p1467_p9 = pnand %p1466_p8, %p1460_p5 }
  0x19   :  { %1470 = shalt.err (!%p1467_p9)
}
  0x1a   :  { %s1585_s27 = smov 16   ;;  %s1586_s28 = smov 1  }
  0x1b   :  { %66 = dma.hbm_to_vmem [thread:$0]  %s1774_s4, 32, %s61_s25, [#allocation9], %s1585_s27, %s1585_s27, %s1586_s28  }
  0x1c   :  { %s1587_s12 = smov [#allocation2]   ;;  %s1588_s14 = smov [#allocation7]  }
  0x1d   :  { %s27_s13 = sshll.u32 %s1587_s12, 4  ;;  %s49_s1 = sshll.u32 %s1588_s14, 4  ;;  %s28_s13 = int_to_ptr.vmem [resolvable:$true] %s27_s13  ;;  %s50_s1 = int_to_ptr.vmem [resolvable:$true] %s49_s1 }
  0x1e   :  { %s1479_s15 = scalar_lea.vmem %s28_s13, 128  ;;  %p1484_p11 = scmp.lt.s32.totalorder %s28_s13, %s28_s13 }
  0x1f   :  { %p1480_p10 = scmp.ne.s32.totalorder %s28_s13, %s1479_s15  ;;  %p1485_p12 = scmp.lt.s32.totalorder %s1479_s15, %s1479_s15 }
  0x21   :  { %p1486_p13 = por %p1485_p12, %p1484_p11 }
  0x23   :  { %p1487_p0 = pnand %p1486_p13, %p1480_p10 }
  0x25   :  { %1490 = shalt.err (!%p1487_p0)
}
  0x26   :  { %30 = dma.hbm_to_vmem [thread:$0]  %s1770_s0, 128, %s28_s13, [#allocation3]  }
  0x27   :  { %s1499_s18 = scalar_lea.vmem %s50_s1, 16  ;;  %s1503_s4 = scalar_lea.vmem %s50_s1, 32 }
  0x28   :  { %p1500_p1 = scmp.ne.s32.totalorder %s50_s1, %s1499_s18  ;;  %p1504_p2 = scmp.lt.s32.totalorder %s50_s1, %s50_s1 }
  0x29   :  { %p1505_p3 = scmp.lt.s32.totalorder %s1503_s4, %s1499_s18 }
  0x2b   :  { %p1506_p4 = por %p1505_p3, %p1504_p2 }
  0x2d   :  { %p1507_p5 = pnand %p1506_p4, %p1500_p1 }
  0x2f   :  { %1510 = shalt.err (!%p1507_p5)
}
  0x30   :  { %52 = dma.hbm_to_vmem [thread:$0]  %s1772_s2, 16, %s50_s1, [#allocation6]  }
  0x31   :  { %s1589_s23 = smov [#allocation10]  }
  0x32   :  { %s72_s24 = sshll.u32 %s1589_s23, 4  ;;  %s73_s24 = int_to_ptr.vmem [resolvable:$true] %s72_s24 }
  0x33   :  { %s1519_s25 = scalar_lea.vmem %s73_s24, 16384  ;;  %p1524_p7 = scmp.lt.s32.totalorder %s73_s24, %s73_s24 }
  0x34   :  { %p1520_p6 = scmp.ne.s32.totalorder %s73_s24, %s1519_s25  ;;  %p1525_p8 = scmp.lt.s32.totalorder %s1519_s25, %s1519_s25 }
  0x36   :  { %p1526_p9 = por %p1525_p8, %p1524_p7 }
  0x38   :  { %p1527_p10 = pnand %p1526_p9, %p1520_p6 }
  0x3a   :  { %1530 = shalt.err (!%p1527_p10)
}
  0x3b   :  { %s1590_s0 = smov 512   ;;  %s1591_s26 = smov 32  }
  0x3c   :  { %78 = dma.hbm_to_vmem [thread:$0]  %s1775_s5, 16384, %s73_s24, [#allocation9], %s1590_s0, %s1590_s0, %s1591_s26  }
  0x3d   :  { %s1592_s29 = smov [#allocation11]  }
  0x3e   :  { %s86_s30 = sshll.u32 %s1592_s29, 4  ;;  %s87_s30 = int_to_ptr.vmem [resolvable:$true] %s86_s30 }
  0x3f   :  { %s1539_s2 = scalar_lea.vmem %s87_s30, 16384  ;;  %p1544_p12 = scmp.lt.s32.totalorder %s87_s30, %s87_s30 }
  0x40   :  { %p1540_p11 = scmp.ne.s32.totalorder %s87_s30, %s1539_s2  ;;  %p1545_p13 = scmp.lt.s32.totalorder %s1539_s2, %s1539_s2 }
  0x42   :  { %p1546_p0 = por %p1545_p13, %p1544_p12 }
  0x44   :  { %p1547_p1 = pnand %p1546_p0, %p1540_p11 }
  0x46   :  { %1550 = shalt.err (!%p1547_p1)
}
  0x47   :  { %92 = dma.hbm_to_vmem [thread:$0]  %s1777_s7, 16384, %s87_s30, [#allocation12], %s1582_s20, %s1582_s20, %s1583_s21  }
  0x48   :  { %1571 = dma.done.wait [#allocation3], 128  }
  0x49   :  { %1572 = vsyncadd [#allocation3], 4294967168 }
  0x4a   :  { %1573 = dma.done.wait [#allocation6], 2064  }
  0x4b   :  { %1574 = vsyncadd [#allocation6], 4294965232 }
  0x4c   :  { %1575 = dma.done.wait [#allocation9], 16416  }
  0x4d   :  { %1576 = vsyncadd [#allocation9], 4294950880 }
  0x4e   :  { %1577 = dma.done.wait [#allocation12], 16384  }
  0x4f   :  { %1578 = vsyncadd [#allocation12], 4294950912  ;;  %v1593_v0 = vmov 0.0   ;;  %vm1594_vm0 = vmmov 0   ;;  %v133_v1 = vld [vmem:[#allocation5 + $0x78] sm:$0xff]  ;;  %v132_v2 = vld [vmem:[#allocation5 + $0x70] sm:$0xff] }
  0x50   :  { %1375 = vmatprep.subr.mxu0 %v1593_v0  ;;  %1407 = vmatprep.mubr.msk.f32.mxu0 %vm1594_vm0, %v1593_v0  ;;  %v131_v3 = vld [vmem:[#allocation5 + $0x68] sm:$0xff]  ;;  %v130_v4 = vld [vmem:[#allocation5 + $0x60] sm:$0xff]  ;;  %v129_v5 = vld [vmem:[#allocation5 + $0x58] sm:$0xff]  ;;  %s1595_s23 = smov [#allocation13]  }
  0x51   :  { %389 = vmatprep.mubr.f32.mxu1 %v1593_v0  ;;  %1376 = vmatpush3.msra.mxu0 %v133_v1  ;;  %v128_v6 = vld [vmem:[#allocation5 + $0x50] sm:$0xff]  ;;  %v127_v7 = vld [vmem:[#allocation5 + $0x48] sm:$0xff]  ;;  %v126_v8 = vld [vmem:[#allocation5 + $0x40] sm:$0xff]  ;;  %s1194_s24 = sshll.u32 %s1595_s23, 4  ;;  %s1195_s24 = int_to_ptr.vmem [resolvable:$true] %s1194_s24 }
  0x52   :  { %1377 = vmatprep.subr.mxu0 %v1593_v0  ;;  %v125_v9 = vld [vmem:[#allocation5 + $0x38] sm:$0xff]  ;;  %v124_v10 = vld [vmem:[#allocation5 + $0x30] sm:$0xff]  ;;  %v123_v11 = vld [vmem:[#allocation5 + $0x28] sm:$0xff]  ;;  %s1551_s25 = scalar_lea.vmem %s1195_s24, 128  ;;  %p1556_p3 = scmp.lt.s32.totalorder %s1195_s24, %s1195_s24 }
  0x53   :  { %1378 = vmatpush3.msra.mxu0 %v132_v2  ;;  %v122_v12 = vld [vmem:[#allocation5 + $0x20] sm:$0xff]  ;;  %v121_v13 = vld [vmem:[#allocation5 + $0x18] sm:$0xff]  ;;  %v120_v14 = vld [vmem:[#allocation5 + $0x10] sm:$0xff]  ;;  %p1552_p2 = scmp.ne.s32.totalorder %s1195_s24, %s1551_s25  ;;  %p1557_p4 = scmp.lt.s32.totalorder %s1551_s25, %s1551_s25 }
  0x54   :  { %1379 = vmatprep.subr.mxu0 %v1593_v0  ;;  %v119_v15 = vld [vmem:[#allocation5 + $0x8] sm:$0xff]  ;;  %v118_v16 = vld [vmem:[#allocation5] sm:$0xff]  ;;  %v117_v17 = vld [vmem:[#allocation2] sm:$0xff] }
  0x55   :  { %1380 = vmatpush3.msra.mxu0 %v131_v3  ;;  %v1206_v18 = vld [vmem:[#allocation7] ss:$0 sm:$0xff]  ;;  %v300_v22 = vld [vmem:[#allocation10 + $0x1e8] sm:$0xff]  ;;  %v299_v24 = vld [vmem:[#allocation10 + $0x1e0] sm:$0xff]  ;;  %p1558_p5 = por %p1557_p4, %p1556_p3 }
  0x56   :  { %1381 = vmatprep.subr.mxu0 %v1593_v0  ;;  %v302_v23 = vld [vmem:[#allocation10 + $0x1f8] sm:$0xff]  ;;  %325 = vmatprep.subr.mxu1 %v300_v22  ;;  %v301_v25 = vld [vmem:[#allocation10 + $0x1f0] sm:$0xff]  ;;  %v296_v26 = vld [vmem:[#allocation10 + $0x1c8] sm:$0xff] }
  0x57   :  { %1382 = vmatpush3.msra.mxu0 %v130_v4  ;;  %v298_v27 = vld [vmem:[#allocation10 + $0x1d8] sm:$0xff]  ;;  %326 = vmatpush1.msra.mxu1 %v299_v24  ;;  %v295_v28 = vld [vmem:[#allocation10 + $0x1c0] sm:$0xff]  ;;  %v297_v29 = vld [vmem:[#allocation10 + $0x1d0] sm:$0xff]  ;;  %p1559_p6 = pnand %p1558_p5, %p1552_p2 }
  0x58   :  { %1383 = vmatprep.subr.mxu0 %v1593_v0  ;;  %v292_v30 = vld [vmem:[#allocation10 + $0x1a8] sm:$0xff]  ;;  %327 = vmatprep.subr.mxu1 %v296_v26  ;;  %v294_v31 = vld [vmem:[#allocation10 + $0x1b8] sm:$0xff]  ;;  %v291_v32 = vld [vmem:[#allocation10 + $0x1a0] sm:$0xff] }
  0x59   :  { %1384 = vmatpush3.msra.mxu0 %v129_v5  ;;  %v293_v33 = vld [vmem:[#allocation10 + $0x1b0] sm:$0xff]  ;;  %328 = vmatpush1.msra.mxu1 %v295_v28  ;;  %v288_v34 = vld [vmem:[#allocation10 + $0x188] sm:$0xff]  ;;  %v290_v35 = vld [vmem:[#allocation10 + $0x198] sm:$0xff] }
  0x5a   :  { %1385 = vmatprep.subr.mxu0 %v1593_v0  ;;  %329 = vmatprep.subr.mxu1 %v292_v30  ;;  %v287_v36 = vld [vmem:[#allocation10 + $0x180] sm:$0xff]  ;;  %v289_v37 = vld [vmem:[#allocation10 + $0x190] sm:$0xff]  ;;  %v284_v42 = vld [vmem:[#allocation10 + $0x168] sm:$0xff] }
  0x5b   :  { %1386 = vmatpush3.msra.mxu0 %v128_v6  ;;  %330 = vmatpush1.msra.mxu1 %v291_v32  ;;  %v286_v43 = vld [vmem:[#allocation10 + $0x178] sm:$0xff]  ;;  %v283_v44 = vld [vmem:[#allocation10 + $0x160] sm:$0xff]  ;;  %v285_v45 = vld [vmem:[#allocation10 + $0x170] sm:$0xff] }
  0x5c   :  { %1387 = vmatprep.subr.mxu0 %v1593_v0  ;;  %331 = vmatprep.subr.mxu1 %v288_v34  ;;  %v280_v46 = vld [vmem:[#allocation10 + $0x148] sm:$0xff]  ;;  %v282_v47 = vld [vmem:[#allocation10 + $0x158] sm:$0xff]  ;;  %v279_v48 = vld [vmem:[#allocation10 + $0x140] sm:$0xff] }
  0x5d   :  { %1388 = vmatpush3.msra.mxu0 %v127_v7  ;;  %332 = vmatpush1.msra.mxu1 %v287_v36  ;;  %v281_v49 = vld [vmem:[#allocation10 + $0x150] sm:$0xff]  ;;  %v276_v50 = vld [vmem:[#allocation10 + $0x128] sm:$0xff]  ;;  %v278_v51 = vld [vmem:[#allocation10 + $0x138] sm:$0xff] }
  0x5e   :  { %1389 = vmatprep.subr.mxu0 %v1593_v0  ;;  %333 = vmatprep.subr.mxu1 %v284_v42  ;;  %v275_v52 = vld [vmem:[#allocation10 + $0x120] sm:$0xff]  ;;  %v277_v53 = vld [vmem:[#allocation10 + $0x130] sm:$0xff]  ;;  %v272_v54 = vld [vmem:[#allocation10 + $0x108] sm:$0xff] }
  0x5f   :  { %1390 = vmatpush3.msra.mxu0 %v126_v8  ;;  %334 = vmatpush1.msra.mxu1 %v283_v44  ;;  %v274_v55 = vld [vmem:[#allocation10 + $0x118] sm:$0xff]  ;;  %v271_v56 = vld [vmem:[#allocation10 + $0x100] sm:$0xff]  ;;  %v273_v57 = vld [vmem:[#allocation10 + $0x110] sm:$0xff] }
  0x60   :  { %1391 = vmatprep.subr.mxu0 %v1593_v0  ;;  %335 = vmatprep.subr.mxu1 %v280_v46  ;;  %v268_v58 = vld [vmem:[#allocation10 + $0xe8] sm:$0xff]  ;;  %v270_v59 = vld [vmem:[#allocation10 + $0xf8] sm:$0xff]  ;;  %v267_v60 = vld [vmem:[#allocation10 + $0xe0] sm:$0xff] }
  0x61   :  { %1392 = vmatpush3.msra.mxu0 %v125_v9  ;;  %336 = vmatpush1.msra.mxu1 %v279_v48  ;;  %v269_v61 = vld [vmem:[#allocation10 + $0xf0] sm:$0xff]  ;;  %v264_v62 = vld [vmem:[#allocation10 + $0xc8] sm:$0xff]  ;;  %v266_v63 = vld [vmem:[#allocation10 + $0xd8] sm:$0xff] }
  0x62   :  { %1393 = vmatprep.subr.mxu0 %v1593_v0  ;;  %337 = vmatprep.subr.mxu1 %v276_v50  ;;  %v263_v1 = vld [vmem:[#allocation10 + $0xc0] sm:$0xff]  ;;  %v265_v2 = vld [vmem:[#allocation10 + $0xd0] sm:$0xff]  ;;  %v260_v3 = vld [vmem:[#allocation10 + $0xa8] sm:$0xff] }
  0x63   :  { %1394 = vmatpush3.msra.mxu0 %v124_v10  ;;  %338 = vmatpush1.msra.mxu1 %v275_v52  ;;  %v262_v4 = vld [vmem:[#allocation10 + $0xb8] sm:$0xff]  ;;  %v259_v5 = vld [vmem:[#allocation10 + $0xa0] sm:$0xff]  ;;  %v261_v6 = vld [vmem:[#allocation10 + $0xb0] sm:$0xff] }
  0x64   :  { %1395 = vmatprep.subr.mxu0 %v1593_v0  ;;  %339 = vmatprep.subr.mxu1 %v272_v54  ;;  %v256_v7 = vld [vmem:[#allocation10 + $0x88] sm:$0xff]  ;;  %v258_v8 = vld [vmem:[#allocation10 + $0x98] sm:$0xff]  ;;  %v255_v9 = vld [vmem:[#allocation10 + $0x80] sm:$0xff] }
  0x65   :  { %1396 = vmatpush3.msra.mxu0 %v123_v11  ;;  %340 = vmatpush1.msra.mxu1 %v271_v56  ;;  %v257_v10 = vld [vmem:[#allocation10 + $0x90] sm:$0xff]  ;;  %v252_v11 = vld [vmem:[#allocation10 + $0x68] sm:$0xff]  ;;  %v243_v22 = vld [vmem:[#allocation10 + $0x20] sm:$0xff] }
  0x66   :  { %1397 = vmatprep.subr.mxu0 %v1593_v0  ;;  %341 = vmatprep.subr.mxu1 %v268_v58  ;;  %v240_v24 = vld [vmem:[#allocation10 + $0x8] sm:$0xff]  ;;  %v239_v26 = vld [vmem:[#allocation10] sm:$0xff]  ;;  %v502_v28 = vld [vmem:[#allocation11 + $0xf8] sm:$0xff] }
  0x67   :  { %1398 = vmatpush3.msra.mxu0 %v122_v12  ;;  %342 = vmatpush1.msra.mxu1 %v267_v60  ;;  %v254_v12 = vld [vmem:[#allocation10 + $0x78] sm:$0xff]  ;;  %v1207_v34 = vld [vmem:[%s1773_s3] ss:$0 sm:$0xff]  ;;  %v500_v46 = vld [vmem:[#allocation11 + $0xe8] sm:$0xff] }
  0x68   :  { %1399 = vmatprep.subr.mxu0 %v1593_v0  ;;  %343 = vmatprep.subr.mxu1 %v264_v62  ;;  %v1208_v36 = vld [vmem:[#allocation8] ss:$0 sm:$0xff]  ;;  %v501_v42 = vld [vmem:[#allocation11 + $0xf0] sm:$0xff]  ;;  %v484_v48 = vld [vmem:[#allocation11 + $0x68] sm:$0xff] }
  0x69   :  { %1400 = vmatpush3.msra.mxu0 %v121_v13  ;;  %344 = vmatpush1.msra.mxu1 %v263_v1  ;;  %v251_v13 = vld [vmem:[#allocation10 + $0x60] sm:$0xff]  ;;  %v485_v44 = vld [vmem:[#allocation11 + $0x70] sm:$0xff]  ;;  %v530_v54 = vld [vmem:[#allocation11 + $0x1d8] sm:$0xff] }
  0x6a   :  { %1401 = vmatprep.subr.mxu0 %v1593_v0  ;;  %345 = vmatprep.subr.mxu1 %v260_v3  ;;  %v531_v50 = vld [vmem:[#allocation11 + $0x1e0] sm:$0xff]  ;;  %v514_v56 = vld [vmem:[#allocation11 + $0x158] sm:$0xff]  ;;  %v529_v58 = vld [vmem:[#allocation11 + $0x1d0] sm:$0xff] }
  0x6b   :  { %1402 = vmatpush3.msra.mxu0 %v120_v14  ;;  %346 = vmatpush1.msra.mxu1 %v259_v5  ;;  %v253_v14 = vld [vmem:[#allocation10 + $0x70] sm:$0xff]  ;;  %v515_v52 = vld [vmem:[#allocation11 + $0x160] sm:$0xff]  ;;  %v528_v62 = vld [vmem:[#allocation11 + $0x1c8] sm:$0xff] }
  0x6c   :  { %1403 = vmatprep.subr.mxu0 %v1593_v0  ;;  %347 = vmatprep.subr.mxu1 %v256_v7  ;;  %v513_v60 = vld [vmem:[#allocation11 + $0x150] sm:$0xff]  ;;  %v512_v1 = vld [vmem:[#allocation11 + $0x148] sm:$0xff]  ;;  %v527_v3 = vld [vmem:[#allocation11 + $0x1c0] sm:$0xff] }
  0x6d   :  { %1404 = vmatpush3.msra.mxu0 %v119_v15  ;;  %348 = vmatpush1.msra.mxu1 %v255_v9  ;;  %v248_v15 = vld [vmem:[#allocation10 + $0x48] sm:$0xff]  ;;  %v511_v5 = vld [vmem:[#allocation11 + $0x140] sm:$0xff]  ;;  %v526_v7 = vld [vmem:[#allocation11 + $0x1b8] sm:$0xff] }
  0x6e   :  { %1405 = vmatprep.subr.mxu0 %v1593_v0  ;;  %349 = vmatprep.subr.mxu1 %v252_v11  ;;  %v510_v9 = vld [vmem:[#allocation11 + $0x138] sm:$0xff]  ;;  %v525_v11 = vld [vmem:[#allocation11 + $0x1b0] sm:$0xff] }
  0x6f   :  { %1406 = vmatpush3.msra.mxu0 %v118_v16  ;;  %v250_v16 = vld [vmem:[#allocation10 + $0x58] sm:$0xff]  ;;  %350 = vmatpush1.msra.mxu1 %v251_v13  ;;  %v509_v13 = vld [vmem:[#allocation11 + $0x130] sm:$0xff] }
  0x70   :  { %1408 = vmatmul.mubr.f32.vlgmr.msra.gmra.mxu0 %v117_v17  ;;  %396 = vmatprep.subr.mxu0 %v302_v23  ;;  %v247_v17 = vld [vmem:[#allocation10 + $0x40] sm:$0xff]  ;;  %v245_v23 = vld [vmem:[#allocation10 + $0x30] sm:$0xff] }
  0x71   :  { %460 = vmatprep.mubr.f32.mxu0 %v1593_v0  ;;  %397 = vmatpush1.msra.mxu0 %v301_v25  ;;  %v242_v25 = vld [vmem:[#allocation10 + $0x18] sm:$0xff] }
  0x72   :  { %398 = vmatprep.subr.mxu0 %v298_v27  ;;  %351 = vmatprep.subr.mxu1 %v248_v15  ;;  %v241_v27 = vld [vmem:[#allocation10 + $0x10] sm:$0xff]  ;;  %v524_v15 = vld [vmem:[#allocation11 + $0x1a8] sm:$0xff] }
  0x73   :  { %399 = vmatpush1.msra.mxu0 %v297_v29  ;;  %352 = vmatpush1.msra.mxu1 %v247_v17  ;;  %v534_v29 = vld [vmem:[#allocation11 + $0x1f8] sm:$0xff]  ;;  %v508_v17 = vld [vmem:[#allocation11 + $0x128] sm:$0xff] }
  0x74   :  { %400 = vmatprep.subr.mxu0 %v294_v31 }
  0x75   :  { %401 = vmatpush1.msra.mxu0 %v293_v33 }
  0x76   :  { %402 = vmatprep.subr.mxu0 %v290_v35 }
  0x77   :  { %403 = vmatpush1.msra.mxu0 %v289_v37 }
  0x78   :  { %404 = vmatprep.subr.mxu0 %v286_v43  ;;  %v533_v43 = vld [vmem:[#allocation11 + $0x1f0] sm:$0xff] }
  0x79   :  { %405 = vmatpush1.msra.mxu0 %v285_v45  ;;  %v517_v45 = vld [vmem:[#allocation11 + $0x170] sm:$0xff] }
  0x7a   :  { %406 = vmatprep.subr.mxu0 %v282_v47  ;;  %v532_v47 = vld [vmem:[#allocation11 + $0x1e8] sm:$0xff] }
  0x7b   :  { %407 = vmatpush1.msra.mxu0 %v281_v49  ;;  %v516_v49 = vld [vmem:[#allocation11 + $0x168] sm:$0xff] }
  0x7c   :  { %408 = vmatprep.subr.mxu0 %v278_v51  ;;  %v483_v51 = vld [vmem:[#allocation11 + $0x60] sm:$0xff] }
  0x7d   :  { %409 = vmatpush1.msra.mxu0 %v277_v53  ;;  %v498_v53 = vld [vmem:[#allocation11 + $0xd8] sm:$0xff] }
  0x7e   :  { %410 = vmatprep.subr.mxu0 %v274_v55  ;;  %v482_v55 = vld [vmem:[#allocation11 + $0x58] sm:$0xff] }
  0x7f   :  { %411 = vmatpush1.msra.mxu0 %v273_v57  ;;  %v497_v57 = vld [vmem:[#allocation11 + $0xd0] sm:$0xff] }
  0x80   :  { %412 = vmatprep.subr.mxu0 %v270_v59  ;;  %v481_v59 = vld [vmem:[#allocation11 + $0x50] sm:$0xff] }
  0x81   :  { %413 = vmatpush1.msra.mxu0 %v269_v61  ;;  %v496_v61 = vld [vmem:[#allocation11 + $0xc8] sm:$0xff] }
  0x82   :  { %414 = vmatprep.subr.mxu0 %v266_v63  ;;  %v480_v63 = vld [vmem:[#allocation11 + $0x48] sm:$0xff] }
  0x83   :  { %415 = vmatpush1.msra.mxu0 %v265_v2  ;;  %v495_v2 = vld [vmem:[#allocation11 + $0xc0] sm:$0xff] }
  0x84   :  { %416 = vmatprep.subr.mxu0 %v262_v4  ;;  %v479_v4 = vld [vmem:[#allocation11 + $0x40] sm:$0xff] }
  0x85   :  { %417 = vmatpush1.msra.mxu0 %v261_v6  ;;  %v494_v6 = vld [vmem:[#allocation11 + $0xb8] sm:$0xff] }
  0x86   :  { %418 = vmatprep.subr.mxu0 %v258_v8  ;;  %v478_v8 = vld [vmem:[#allocation11 + $0x38] sm:$0xff] }
  0x87   :  { %419 = vmatpush1.msra.mxu0 %v257_v10  ;;  %v493_v10 = vld [vmem:[#allocation11 + $0xb0] sm:$0xff] }
  0x88   :  { %420 = vmatprep.subr.mxu0 %v254_v12  ;;  %v477_v12 = vld [vmem:[#allocation11 + $0x30] sm:$0xff] }
  0x89   :  { %421 = vmatpush1.msra.mxu0 %v253_v14  ;;  %v492_v14 = vld [vmem:[#allocation11 + $0xa8] sm:$0xff] }
  0x8a   :  { %422 = vmatprep.subr.mxu0 %v250_v16  ;;  %v476_v16 = vld [vmem:[#allocation11 + $0x28] sm:$0xff] }
 0x130   :  { %v207_v19 = vpop.f32.mrf.mxu0 }
 0x131   :  { %v1699_v20 = vadd.f32 %v1206_v18, %v207_v19  ;;  %v249_v18 = vld [vmem:[#allocation10 + $0x50] sm:$0xff]  ;;  %v244_v19 = vld [vmem:[#allocation10 + $0x28] sm:$0xff] }
 0x132   :  { %v1409_v21 = vpop.f32.mrf.mxu0  ;;  %423 = vmatpush1.msra.mxu0 %v249_v18  ;;  %353 = vmatprep.subr.mxu1 %v244_v19  ;;  %v491_v18 = vld [vmem:[#allocation11 + $0xa0] sm:$0xff] }
 0x133   :  { %213 = vadd.xlane.f32.xlu0 %v1699_v20  ;;  %v246_v21 = vld [vmem:[#allocation10 + $0x38] sm:$0xff]  ;;  %354 = vmatpush1.msra.mxu1 %v243_v22  ;;  %v523_v19 = vld [vmem:[#allocation11 + $0x1a0] sm:$0xff] }
 0x134   :  { %424 = vmatprep.subr.mxu0 %v246_v21  ;;  %355 = vmatprep.subr.mxu1 %v240_v24  ;;  %v475_v21 = vld [vmem:[#allocation11 + $0x20] sm:$0xff]  ;;  %v522_v24 = vld [vmem:[#allocation11 + $0x198] sm:$0xff] }
 0x135   :  { %425 = vmatpush1.msra.mxu0 %v245_v23  ;;  %356 = vmatpush1.msra.mxu1 %v239_v26  ;;  %v507_v22 = vld [vmem:[#allocation11 + $0x120] sm:$0xff]  ;;  %v490_v23 = vld [vmem:[#allocation11 + $0x98] sm:$0xff] }
 0x136   :  { %426 = vmatprep.subr.mxu0 %v242_v25  ;;  %1235 = vmatprep.subr.mxu1 %v502_v28  ;;  %v474_v25 = vld [vmem:[#allocation11 + $0x18] sm:$0xff]  ;;  %v521_v28 = vld [vmem:[#allocation11 + $0x190] sm:$0xff] }
 0x137   :  { %427 = vmatpush1.msra.mxu0 %v241_v27  ;;  %v506_v26 = vld [vmem:[#allocation11 + $0x118] sm:$0xff]  ;;  %v489_v27 = vld [vmem:[#allocation11 + $0x90] sm:$0xff] }
 0x138   :  { %1270 = vmatprep.subr.mxu0 %v534_v29  ;;  %v473_v29 = vld [vmem:[#allocation11 + $0x10] sm:$0xff] }
 0x1bc   :  { %v214_v38 = vpop.xlane.xlu0 %213 }
 0x1bd   :  { %v216_v39 = vmul.f32 0.0078125, %v214_v38 }
 0x1bf   :  { %v1703_v40 = vsub.f32 %v1699_v20, %v216_v39  ;;  %v486_v39 = vld [vmem:[#allocation11 + $0x78] sm:$0xff] }
 0x1c1   :  { %v218_v41 = vmul.f32 %v1703_v40, %v1703_v40 }
 0x1c3   :  { %219 = vadd.xlane.f32.xlu0 %v218_v41  ;;  %v518_v41 = vld [vmem:[#allocation11 + $0x178] sm:$0xff] }
 0x24c   :  { %v220_v30 = vpop.xlane.xlu0 %219 }
 0x24d   :  { %v221_v31 = vmul.f32 0.0078125, %v220_v30  ;;  %v505_v30 = vld [vmem:[#allocation11 + $0x110] sm:$0xff] }
 0x24f   :  { %v222_v32 = vadd.f32 1e-05, %v221_v31  ;;  %v488_v31 = vld [vmem:[#allocation11 + $0x88] sm:$0xff] }
 0x251   :  { %1425 = vrsqrt.f32 %v222_v32  ;;  %v520_v32 = vld [vmem:[#allocation11 + $0x188] sm:$0xff] }
 0x25e   :  { %v1426_v33 = vpop.eup %1425 }
 0x25f   :  { %v224_v35 = vmul.f32 %v1426_v33, %v1703_v40  ;;  %v499_v40 = vld [vmem:[#allocation11 + $0xe0] sm:$0xff]  ;;  %v472_v33 = vld [vmem:[#allocation11 + $0x8] sm:$0xff] }
 0x261   :  { %v231_v37 = vmul.f32 %v1207_v34, %v224_v35  ;;  %v504_v34 = vld [vmem:[#allocation11 + $0x108] sm:$0xff]  ;;  %v487_v35 = vld [vmem:[#allocation11 + $0x80] sm:$0xff] }
 0x263   :  { %v238_v38 = vadd.f32 %v1208_v36, %v231_v37  ;;  %v519_v36 = vld [vmem:[#allocation11 + $0x180] sm:$0xff] }
 0x264   :  { %v471_v37 = vld [vmem:[#allocation11] sm:$0xff] }
 0x265   :  { %390 = vmatmul.mubr.f32.vlgmr.msra.gmra.mxu1 %v238_v38  ;;  %461 = vmatmul.mubr.f32.vlgmr.msra.gmra.mxu0 %v238_v38  ;;  %v503_v38 = vld [vmem:[#allocation11 + $0x100] sm:$0xff] }
 0x266   :  { %1236 = vmatpush3.msra.mxu1 %v486_v39  ;;  %1271 = vmatpush3.msra.mxu0 %v518_v41  ;;  %v305_v39 = vlaneseq }
 0x267   :  { %1237 = vmatprep.subr.mxu1 %v501_v42  ;;  %1272 = vmatprep.subr.mxu0 %v533_v43 }
 0x268   :  { %1238 = vmatpush3.msra.mxu1 %v485_v44  ;;  %1273 = vmatpush3.msra.mxu0 %v517_v45  ;;  %v1711_v41 = vshrl.u32 %v305_v39, 7  ;;  %v303_v44 = vld [vmem:[%s1776_s6] sm:$0xf] }
 0x269   :  { %1239 = vmatprep.subr.mxu1 %v500_v46  ;;  %1274 = vmatprep.subr.mxu0 %v532_v47  ;;  %v751_v39 = vld [vmem:[#allocation10 + $0x330] sm:$0xff] }
 0x26a   :  { %1240 = vmatpush3.msra.mxu1 %v484_v48  ;;  %1275 = vmatpush3.msra.mxu0 %v516_v49  ;;  %v307_v42 = vsub.s32 0, %v1711_v41  ;;  %v315_v43 = vsub.s32 2, %v1711_v41  ;;  %v311_v45 = vsub.s32 1, %v1711_v41  ;;  %v319_v46 = vsub.s32 3, %v1711_v41  ;;  %v1215_v41 = vld [vmem:[%s1778_s8 + $0x1] ss:$0 sm:$0xff] }
 0x26b   :  { %1241 = vmatprep.subr.mxu1 %v499_v40  ;;  %1276 = vmatprep.subr.mxu0 %v531_v50 }
 0x26c   :  { %1242 = vmatpush3.msra.mxu1 %v483_v51  ;;  %1277 = vmatpush3.msra.mxu0 %v515_v52  ;;  %v308_v47 = vrot.slane %v303_v44, %v307_v42  ;;  %v316_v48 = vrot.slane %v303_v44, %v315_v43  ;;  %v312_v49 = vrot.slane %v303_v44, %v311_v45 }
 0x26d   :  { %1243 = vmatprep.subr.mxu1 %v498_v53  ;;  %1278 = vmatprep.subr.mxu0 %v530_v54  ;;  %v320_v40 = vrot.slane %v303_v44, %v319_v46  ;;  %v746_v44 = vld [vmem:[#allocation10 + $0x308] sm:$0xff] }
 0x26e   :  { %1244 = vmatpush3.msra.mxu1 %v482_v55  ;;  %1279 = vmatpush3.msra.mxu0 %v514_v56 }
 0x26f   :  { %1245 = vmatprep.subr.mxu1 %v497_v57  ;;  %1280 = vmatprep.subr.mxu0 %v529_v58 }
 0x270   :  { %1246 = vmatpush3.msra.mxu1 %v481_v59  ;;  %1281 = vmatpush3.msra.mxu0 %v513_v60 }
 0x271   :  { %1247 = vmatprep.subr.mxu1 %v496_v61  ;;  %1282 = vmatprep.subr.mxu0 %v528_v62 }
 0x272   :  { %1248 = vmatpush3.msra.mxu1 %v480_v63  ;;  %1283 = vmatpush3.msra.mxu0 %v512_v1  ;;  %v1209_v1 = vld [vmem:[%s1778_s8] ss:$0 sm:$0xff] }
 0x273   :  { %1249 = vmatprep.subr.mxu1 %v495_v2  ;;  %1284 = vmatprep.subr.mxu0 %v527_v3 }
 0x274   :  { %1250 = vmatpush3.msra.mxu1 %v479_v4  ;;  %1285 = vmatpush3.msra.mxu0 %v511_v5 }
 0x275   :  { %1251 = vmatprep.subr.mxu1 %v494_v6  ;;  %1286 = vmatprep.subr.mxu0 %v526_v7 }
 0x276   :  { %1252 = vmatpush3.msra.mxu1 %v478_v8  ;;  %1287 = vmatpush3.msra.mxu0 %v510_v9  ;;  %v774_v9 = vld [vmem:[#allocation10 + $0x3e8] sm:$0xff] }
 0x277   :  { %1253 = vmatprep.subr.mxu1 %v493_v10  ;;  %1288 = vmatprep.subr.mxu0 %v525_v11  ;;  %v776_v10 = vld [vmem:[#allocation10 + $0x3f8] sm:$0xff]  ;;  %v775_v11 = vld [vmem:[#allocation10 + $0x3f0] sm:$0xff] }
 0x278   :  { %1254 = vmatpush3.msra.mxu1 %v477_v12  ;;  %1289 = vmatpush3.msra.mxu0 %v509_v13  ;;  %v770_v12 = vld [vmem:[#allocation10 + $0x3c8] sm:$0xff]  ;;  %v772_v13 = vld [vmem:[#allocation10 + $0x3d8] sm:$0xff] }
 0x279   :  { %1255 = vmatprep.subr.mxu1 %v492_v14  ;;  %1290 = vmatprep.subr.mxu0 %v524_v15  ;;  %v769_v14 = vld [vmem:[#allocation10 + $0x3c0] sm:$0xff]  ;;  %v771_v15 = vld [vmem:[#allocation10 + $0x3d0] sm:$0xff] }
 0x27a   :  { %1256 = vmatpush3.msra.mxu1 %v476_v16  ;;  %1291 = vmatpush3.msra.mxu0 %v508_v17  ;;  %v766_v16 = vld [vmem:[#allocation10 + $0x3a8] sm:$0xff]  ;;  %v768_v17 = vld [vmem:[#allocation10 + $0x3b8] sm:$0xff] }
 0x27b   :  { %1257 = vmatprep.subr.mxu1 %v491_v18  ;;  %1292 = vmatprep.subr.mxu0 %v523_v19  ;;  %v767_v18 = vld [vmem:[#allocation10 + $0x3b0] sm:$0xff]  ;;  %v762_v19 = vld [vmem:[#allocation10 + $0x388] sm:$0xff] }
 0x27c   :  { %1258 = vmatpush3.msra.mxu1 %v475_v21  ;;  %1293 = vmatpush3.msra.mxu0 %v507_v22  ;;  %v764_v21 = vld [vmem:[#allocation10 + $0x398] sm:$0xff]  ;;  %v761_v22 = vld [vmem:[#allocation10 + $0x380] sm:$0xff] }
 0x27d   :  { %1259 = vmatprep.subr.mxu1 %v490_v23  ;;  %1294 = vmatprep.subr.mxu0 %v522_v24  ;;  %v763_v23 = vld [vmem:[#allocation10 + $0x390] sm:$0xff] }
 0x27e   :  { %1260 = vmatpush3.msra.mxu1 %v474_v25  ;;  %1295 = vmatpush3.msra.mxu0 %v506_v26 }
 0x27f   :  { %1261 = vmatprep.subr.mxu1 %v489_v27  ;;  %1296 = vmatprep.subr.mxu0 %v521_v28  ;;  %v758_v28 = vld [vmem:[#allocation10 + $0x368] sm:$0xff] }
 0x280   :  { %1262 = vmatpush3.msra.mxu1 %v473_v29  ;;  %1297 = vmatpush3.msra.mxu0 %v505_v30  ;;  %v760_v29 = vld [vmem:[#allocation10 + $0x378] sm:$0xff]  ;;  %v757_v30 = vld [vmem:[#allocation10 + $0x360] sm:$0xff] }
 0x281   :  { %1263 = vmatprep.subr.mxu1 %v488_v31  ;;  %1298 = vmatprep.subr.mxu0 %v520_v32  ;;  %v759_v31 = vld [vmem:[#allocation10 + $0x370] sm:$0xff]  ;;  %v754_v32 = vld [vmem:[#allocation10 + $0x348] sm:$0xff] }
 0x282   :  { %1264 = vmatpush3.msra.mxu1 %v472_v33  ;;  %1299 = vmatpush3.msra.mxu0 %v504_v34  ;;  %v756_v33 = vld [vmem:[#allocation10 + $0x358] sm:$0xff]  ;;  %v753_v34 = vld [vmem:[#allocation10 + $0x340] sm:$0xff] }
 0x283   :  { %1265 = vmatprep.subr.mxu1 %v487_v35  ;;  %1300 = vmatprep.subr.mxu0 %v519_v36  ;;  %v755_v35 = vld [vmem:[#allocation10 + $0x350] sm:$0xff]  ;;  %v750_v36 = vld [vmem:[#allocation10 + $0x328] sm:$0xff] }
 0x284   :  { %1266 = vmatpush3.msra.mxu1 %v471_v37  ;;  %1301 = vmatpush3.msra.mxu0 %v503_v38  ;;  %v752_v37 = vld [vmem:[#allocation10 + $0x338] sm:$0xff]  ;;  %v749_v38 = vld [vmem:[#allocation10 + $0x320] sm:$0xff] }
 0x285   :  { %800 = vmatprep.subr.mxu1 %v774_v9  ;;  %871 = vmatprep.subr.mxu0 %v776_v10  ;;  %v721_v9 = vld [vmem:[#allocation10 + $0x240] sm:$0xff]  ;;  %v723_v10 = vld [vmem:[#allocation10 + $0x250] sm:$0xff] }
 0x325   :  { %v391_v50 = vpop.f32.mrf.mxu1  ;;  %v462_v51 = vpop.f32.mrf.mxu0 }
 0x326   :  { %v392_v52 = vadd.f32 %v391_v50, %v308_v47  ;;  %v463_v53 = vadd.f32 %v462_v51, %v316_v48  ;;  %v748_v47 = vld [vmem:[#allocation10 + $0x318] sm:$0xff]  ;;  %v745_v48 = vld [vmem:[#allocation10 + $0x300] sm:$0xff] }
 0x327   :  { %v393_v54 = vpop.f32.mrf.mxu1  ;;  %v464_v55 = vpop.f32.mrf.mxu0  ;;  %v744_v50 = vld [vmem:[#allocation10 + $0x2f8] sm:$0xff]  ;;  %v741_v51 = vld [vmem:[#allocation10 + $0x2e0] sm:$0xff] }
 0x328   :  { %v394_v56 = vadd.f32 %v393_v54, %v312_v49  ;;  %v465_v57 = vadd.f32 %v464_v55, %v320_v40  ;;  %v467_v60 = vmax.f32 %v392_v52, 0.0  ;;  %v469_v61 = vmax.f32 %v463_v53, 0.0  ;;  %v747_v49 = vld [vmem:[#allocation10 + $0x310] sm:$0xff]  ;;  %v742_v40 = vld [vmem:[#allocation10 + $0x2e8] sm:$0xff]  ;;  %v740_v54 = vld [vmem:[#allocation10 + $0x2d8] sm:$0xff] }
 0x329   :  { %v743_v52 = vld [vmem:[#allocation10 + $0x2f0] sm:$0xff]  ;;  %v738_v53 = vld [vmem:[#allocation10 + $0x2c8] sm:$0xff]  ;;  %v737_v55 = vld [vmem:[#allocation10 + $0x2c0] sm:$0xff] }
 0x32a   :  { %v468_v58 = vmax.f32 %v394_v56, 0.0  ;;  %v470_v59 = vmax.f32 %v465_v57, 0.0  ;;  %v739_v56 = vld [vmem:[#allocation10 + $0x2d0] sm:$0xff]  ;;  %v734_v57 = vld [vmem:[#allocation10 + $0x2a8] sm:$0xff] }
 0x32c   :  { %606 = vmatprep.mubr.f32.mxu1 %v468_v58  ;;  %676 = vmatprep.mubr.f32.mxu0 %v470_v59  ;;  %v736_v58 = vld [vmem:[#allocation10 + $0x2b8] sm:$0xff]  ;;  %v733_v59 = vld [vmem:[#allocation10 + $0x2a0] sm:$0xff] }
 0x32d   :  { %607 = vmatmul.mubr.f32.vlgmr.msra.gmra.mxu1 %v467_v60  ;;  %677 = vmatmul.mubr.f32.vlgmr.msra.gmra.mxu0 %v469_v61  ;;  %v735_v60 = vld [vmem:[#allocation10 + $0x2b0] sm:$0xff]  ;;  %v730_v61 = vld [vmem:[#allocation10 + $0x288] sm:$0xff] }
 0x32e   :  { %864 = vmatprep.mubr.f32.mxu1 %v1593_v0  ;;  %935 = vmatprep.mubr.f32.mxu0 %v1593_v0  ;;  %v773_v0 = vld [vmem:[#allocation10 + $0x3e0] sm:$0xff] }
 0x32f   :  { %801 = vmatpush1.msra.mxu1 %v773_v0  ;;  %872 = vmatpush1.msra.mxu0 %v775_v11  ;;  %v718_v0 = vld [vmem:[#allocation10 + $0x228] sm:$0xff]  ;;  %v720_v11 = vld [vmem:[#allocation10 + $0x238] sm:$0xff] }
 0x330   :  { %802 = vmatprep.subr.mxu1 %v770_v12  ;;  %873 = vmatprep.subr.mxu0 %v772_v13  ;;  %v717_v12 = vld [vmem:[#allocation10 + $0x220] sm:$0xff]  ;;  %v719_v13 = vld [vmem:[#allocation10 + $0x230] sm:$0xff] }
 0x331   :  { %803 = vmatpush1.msra.mxu1 %v769_v14  ;;  %874 = vmatpush1.msra.mxu0 %v771_v15  ;;  %v714_v14 = vld [vmem:[#allocation10 + $0x208] sm:$0xff]  ;;  %v716_v15 = vld [vmem:[#allocation10 + $0x218] sm:$0xff] }
 0x332   :  { %804 = vmatprep.subr.mxu1 %v766_v16  ;;  %875 = vmatprep.subr.mxu0 %v768_v17  ;;  %v713_v16 = vld [vmem:[#allocation10 + $0x200] sm:$0xff]  ;;  %v715_v17 = vld [vmem:[#allocation10 + $0x210] sm:$0xff] }
 0x333   :  { %876 = vmatpush1.msra.mxu0 %v767_v18  ;;  %v1010_v18 = vld [vmem:[#allocation11 + $0x3f8] sm:$0xff] }
 0x334   :  { %877 = vmatprep.subr.mxu0 %v764_v21 }
 0x335   :  { %878 = vmatpush1.msra.mxu0 %v763_v23 }
 0x336   :  { %879 = vmatprep.subr.mxu0 %v760_v29 }
 0x337   :  { %880 = vmatpush1.msra.mxu0 %v759_v31  ;;  %v994_v31 = vld [vmem:[#allocation11 + $0x378] sm:$0xff] }
 0x338   :  { %881 = vmatprep.subr.mxu0 %v756_v33  ;;  %v1009_v33 = vld [vmem:[#allocation11 + $0x3f0] sm:$0xff] }
 0x339   :  { %882 = vmatpush1.msra.mxu0 %v755_v35  ;;  %v993_v35 = vld [vmem:[#allocation11 + $0x370] sm:$0xff] }
 0x33a   :  { %883 = vmatprep.subr.mxu0 %v752_v37  ;;  %v1008_v37 = vld [vmem:[#allocation11 + $0x3e8] sm:$0xff] }
 0x33b   :  { %884 = vmatpush1.msra.mxu0 %v751_v39  ;;  %v992_v39 = vld [vmem:[#allocation11 + $0x368] sm:$0xff] }
 0x33c   :  { %885 = vmatprep.subr.mxu0 %v748_v47  ;;  %v959_v47 = vld [vmem:[#allocation11 + $0x260] sm:$0xff] }
 0x33d   :  { %886 = vmatpush1.msra.mxu0 %v747_v49  ;;  %v974_v49 = vld [vmem:[#allocation11 + $0x2d8] sm:$0xff] }
 0x33e   :  { %887 = vmatprep.subr.mxu0 %v744_v50  ;;  %v958_v50 = vld [vmem:[#allocation11 + $0x258] sm:$0xff] }
 0x33f   :  { %888 = vmatpush1.msra.mxu0 %v743_v52  ;;  %v973_v52 = vld [vmem:[#allocation11 + $0x2d0] sm:$0xff] }
 0x340   :  { %889 = vmatprep.subr.mxu0 %v740_v54  ;;  %v957_v54 = vld [vmem:[#allocation11 + $0x250] sm:$0xff] }
 0x341   :  { %890 = vmatpush1.msra.mxu0 %v739_v56  ;;  %v972_v56 = vld [vmem:[#allocation11 + $0x2c8] sm:$0xff] }
 0x342   :  { %891 = vmatprep.subr.mxu0 %v736_v58  ;;  %v956_v58 = vld [vmem:[#allocation11 + $0x248] sm:$0xff] }
 0x343   :  { %892 = vmatpush1.msra.mxu0 %v735_v60  ;;  %v971_v60 = vld [vmem:[#allocation11 + $0x2c0] sm:$0xff] }
 0x3ed   :  { %v1267_v62 = vpop.f32.mrf.mxu1  ;;  %v1302_v63 = vpop.f32.mrf.mxu0 }
 0x3ef   :  { %v1268_v2 = vpop.f32.mrf.mxu1  ;;  %v1303_v3 = vpop.f32.mrf.mxu0 }
 0x3f0   :  { %v1269_v4 = vadd.f32 %v1268_v2, %v1267_v62  ;;  %v1304_v6 = vadd.f32 %v1303_v3, %v1302_v63  ;;  %v732_v62 = vld [vmem:[#allocation10 + $0x298] sm:$0xff]  ;;  %v729_v63 = vld [vmem:[#allocation10 + $0x280] sm:$0xff]  ;;  %v726_v2 = vld [vmem:[#allocation10 + $0x268] sm:$0xff] }
 0x3f1   :  { %v728_v3 = vld [vmem:[#allocation10 + $0x278] sm:$0xff]  ;;  %893 = vmatprep.subr.mxu0 %v732_v62  ;;  %v955_v62 = vld [vmem:[#allocation11 + $0x240] sm:$0xff] }
 0x3f2   :  { %v609_v5 = vadd.f32 %v1269_v4, %v1209_v1  ;;  %v731_v1 = vld [vmem:[#allocation10 + $0x290] sm:$0xff]  ;;  %v725_v4 = vld [vmem:[#allocation10 + $0x260] sm:$0xff] }
 0x3f3   :  { %894 = vmatpush1.msra.mxu0 %v731_v1  ;;  %v970_v1 = vld [vmem:[#allocation11 + $0x2b8] sm:$0xff] }
 0x3f4   :  { %v679_v7 = vadd.f32 %v1304_v6, %v609_v5  ;;  %v727_v5 = vld [vmem:[#allocation10 + $0x270] sm:$0xff]  ;;  %v722_v6 = vld [vmem:[#allocation10 + $0x248] sm:$0xff]  ;;  %895 = vmatprep.subr.mxu0 %v728_v3  ;;  %v954_v3 = vld [vmem:[#allocation11 + $0x238] sm:$0xff] }
 0x3f5   :  { %896 = vmatpush1.msra.mxu0 %v727_v5  ;;  %v969_v5 = vld [vmem:[#allocation11 + $0x2b0] sm:$0xff] }
 0x3f6   :  { %v1734_v8 = vadd.f32 %v679_v7, %v1699_v20  ;;  %v765_v20 = vld [vmem:[#allocation10 + $0x3a0] sm:$0xff]  ;;  %v724_v7 = vld [vmem:[#allocation10 + $0x258] sm:$0xff] }
 0x3f7   :  { %805 = vmatpush1.msra.mxu1 %v765_v20  ;;  %897 = vmatprep.subr.mxu0 %v724_v7  ;;  %v978_v20 = vld [vmem:[#allocation11 + $0x2f8] sm:$0xff]  ;;  %v953_v7 = vld [vmem:[#allocation11 + $0x230] sm:$0xff] }
 0x3f8   :  { %687 = vadd.xlane.f32.xlu1 %v1734_v8  ;;  %806 = vmatprep.subr.mxu1 %v762_v19 }
 0x3f9   :  { %807 = vmatpush1.msra.mxu1 %v761_v22  ;;  %898 = vmatpush1.msra.mxu0 %v723_v10  ;;  %v968_v10 = vld [vmem:[#allocation11 + $0x2a8] sm:$0xff] }
 0x3fa   :  { %808 = vmatprep.subr.mxu1 %v758_v28  ;;  %899 = vmatprep.subr.mxu0 %v720_v11  ;;  %v952_v11 = vld [vmem:[#allocation11 + $0x228] sm:$0xff] }
 0x3fb   :  { %809 = vmatpush1.msra.mxu1 %v757_v30  ;;  %900 = vmatpush1.msra.mxu0 %v719_v13  ;;  %v962_v30 = vld [vmem:[#allocation11 + $0x278] sm:$0xff]  ;;  %v967_v13 = vld [vmem:[#allocation11 + $0x2a0] sm:$0xff] }
 0x3fc   :  { %810 = vmatprep.subr.mxu1 %v754_v32  ;;  %901 = vmatprep.subr.mxu0 %v716_v15  ;;  %v977_v32 = vld [vmem:[#allocation11 + $0x2f0] sm:$0xff]  ;;  %v951_v15 = vld [vmem:[#allocation11 + $0x220] sm:$0xff] }
 0x3fd   :  { %811 = vmatpush1.msra.mxu1 %v753_v34  ;;  %902 = vmatpush1.msra.mxu0 %v715_v17  ;;  %v961_v34 = vld [vmem:[#allocation11 + $0x270] sm:$0xff]  ;;  %v966_v17 = vld [vmem:[#allocation11 + $0x298] sm:$0xff] }
 0x3fe   :  { %812 = vmatprep.subr.mxu1 %v750_v36  ;;  %1340 = vmatprep.subr.mxu0 %v1010_v18  ;;  %v976_v36 = vld [vmem:[#allocation11 + $0x2e8] sm:$0xff]  ;;  %v950_v18 = vld [vmem:[#allocation11 + $0x218] sm:$0xff] }
 0x3ff   :  { %813 = vmatpush1.msra.mxu1 %v749_v38  ;;  %v960_v38 = vld [vmem:[#allocation11 + $0x268] sm:$0xff] }
 0x400   :  { %814 = vmatprep.subr.mxu1 %v746_v44  ;;  %v1007_v44 = vld [vmem:[#allocation11 + $0x3e0] sm:$0xff] }
 0x401   :  { %815 = vmatpush1.msra.mxu1 %v745_v48  ;;  %v991_v48 = vld [vmem:[#allocation11 + $0x360] sm:$0xff] }
 0x402   :  { %816 = vmatprep.subr.mxu1 %v742_v40  ;;  %v1006_v40 = vld [vmem:[#allocation11 + $0x3d8] sm:$0xff] }
 0x403   :  { %817 = vmatpush1.msra.mxu1 %v741_v51  ;;  %v990_v51 = vld [vmem:[#allocation11 + $0x358] sm:$0xff] }
 0x404   :  { %818 = vmatprep.subr.mxu1 %v738_v53  ;;  %v1005_v53 = vld [vmem:[#allocation11 + $0x3d0] sm:$0xff] }
 0x405   :  { %819 = vmatpush1.msra.mxu1 %v737_v55  ;;  %v989_v55 = vld [vmem:[#allocation11 + $0x350] sm:$0xff] }
 0x406   :  { %820 = vmatprep.subr.mxu1 %v734_v57  ;;  %v1004_v57 = vld [vmem:[#allocation11 + $0x3c8] sm:$0xff] }
 0x407   :  { %821 = vmatpush1.msra.mxu1 %v733_v59  ;;  %v988_v59 = vld [vmem:[#allocation11 + $0x348] sm:$0xff] }
 0x408   :  { %822 = vmatprep.subr.mxu1 %v730_v61  ;;  %v1003_v61 = vld [vmem:[#allocation11 + $0x3c0] sm:$0xff] }
 0x409   :  { %823 = vmatpush1.msra.mxu1 %v729_v63  ;;  %v987_v63 = vld [vmem:[#allocation11 + $0x340] sm:$0xff] }
 0x40a   :  { %824 = vmatprep.subr.mxu1 %v726_v2  ;;  %v1002_v2 = vld [vmem:[#allocation11 + $0x3b8] sm:$0xff] }
 0x40b   :  { %825 = vmatpush1.msra.mxu1 %v725_v4  ;;  %v986_v4 = vld [vmem:[#allocation11 + $0x338] sm:$0xff] }
 0x40c   :  { %826 = vmatprep.subr.mxu1 %v722_v6  ;;  %v1001_v6 = vld [vmem:[#allocation11 + $0x3b0] sm:$0xff] }
 0x40d   :  { %827 = vmatpush1.msra.mxu1 %v721_v9  ;;  %v985_v9 = vld [vmem:[#allocation11 + $0x330] sm:$0xff] }
 0x40e   :  { %828 = vmatprep.subr.mxu1 %v718_v0  ;;  %v1000_v0 = vld [vmem:[#allocation11 + $0x3a8] sm:$0xff] }
 0x40f   :  { %829 = vmatpush1.msra.mxu1 %v717_v12  ;;  %v984_v12 = vld [vmem:[#allocation11 + $0x328] sm:$0xff] }
 0x410   :  { %830 = vmatprep.subr.mxu1 %v714_v14  ;;  %v999_v14 = vld [vmem:[#allocation11 + $0x3a0] sm:$0xff] }
 0x411   :  { %831 = vmatpush1.msra.mxu1 %v713_v16  ;;  %v983_v16 = vld [vmem:[#allocation11 + $0x320] sm:$0xff] }
 0x412   :  { %1305 = vmatprep.subr.mxu1 %v978_v20  ;;  %v998_v20 = vld [vmem:[#allocation11 + $0x398] sm:$0xff] }
 0x481   :  { %v688_v24 = vpop.xlane.xlu1 %687 }
 0x482   :  { %v689_v25 = vmul.f32 0.0078125, %v688_v24  ;;  %v1211_v24 = vld [vmem:[%s1773_s3 + $0x1] ss:$0 sm:$0xff] }
 0x484   :  { %v1738_v26 = vsub.f32 %v1734_v8, %v689_v25 }
 0x486   :  { %v691_v27 = vmul.f32 %v1738_v26, %v1738_v26 }
 0x488   :  { %692 = vadd.xlane.f32.xlu1 %v691_v27  ;;  %v1212_v27 = vld [vmem:[#allocation8 + $0x1] ss:$0 sm:$0xff] }
 0x511   :  { %v693_v19 = vpop.xlane.xlu1 %692 }
 0x512   :  { %v694_v21 = vmul.f32 0.0078125, %v693_v19  ;;  %v982_v19 = vld [vmem:[#allocation11 + $0x318] sm:$0xff] }
 0x514   :  { %v695_v22 = vadd.f32 1e-05, %v694_v21  ;;  %v965_v21 = vld [vmem:[#allocation11 + $0x290] sm:$0xff] }
 0x516   :  { %1427 = vrsqrt.f32 %v695_v22  ;;  %v997_v22 = vld [vmem:[#allocation11 + $0x390] sm:$0xff] }
 0x523   :  { %v1428_v23 = vpop.eup %1427 }
 0x524   :  { %v697_v25 = vmul.f32 %v1428_v23, %v1738_v26  ;;  %v975_v26 = vld [vmem:[#allocation11 + $0x2e0] sm:$0xff]  ;;  %v949_v23 = vld [vmem:[#allocation11 + $0x210] sm:$0xff] }
 0x526   :  { %v704_v28 = vmul.f32 %v1211_v24, %v697_v25  ;;  %v981_v24 = vld [vmem:[#allocation11 + $0x310] sm:$0xff]  ;;  %v964_v25 = vld [vmem:[#allocation11 + $0x288] sm:$0xff] }
 0x528   :  { %v711_v29 = vadd.f32 %v1212_v27, %v704_v28  ;;  %v996_v27 = vld [vmem:[#allocation11 + $0x388] sm:$0xff] }
 0x529   :  { %v948_v28 = vld [vmem:[#allocation11 + $0x208] sm:$0xff] }
 0x52a   :  { %865 = vmatmul.mubr.f32.vlgmr.msra.gmra.mxu1 %v711_v29  ;;  %936 = vmatmul.mubr.f32.vlgmr.msra.gmra.mxu0 %v711_v29  ;;  %v980_v29 = vld [vmem:[#allocation11 + $0x308] sm:$0xff] }
 0x52b   :  { %1306 = vmatpush3.msra.mxu1 %v962_v30  ;;  %1341 = vmatpush3.msra.mxu0 %v994_v31  ;;  %v963_v30 = vld [vmem:[#allocation11 + $0x280] sm:$0xff] }
 0x52c   :  { %1307 = vmatprep.subr.mxu1 %v977_v32  ;;  %1342 = vmatprep.subr.mxu0 %v1009_v33  ;;  %v995_v31 = vld [vmem:[#allocation11 + $0x380] sm:$0xff] }
 0x52d   :  { %1308 = vmatpush3.msra.mxu1 %v961_v34  ;;  %1343 = vmatpush3.msra.mxu0 %v993_v35  ;;  %v947_v32 = vld [vmem:[#allocation11 + $0x200] sm:$0xff]  ;;  %v1213_v34 = vld [vmem:[%s1776_s6 + $0x4] sm:$0xf] }
 0x52e   :  { %1309 = vmatprep.subr.mxu1 %v976_v36  ;;  %1344 = vmatprep.subr.mxu0 %v1008_v37  ;;  %v979_v33 = vld [vmem:[#allocation11 + $0x300] sm:$0xff]  ;;  %v783_v35 = vrot.slane %v1213_v34, %v307_v42  ;;  %v791_v36 = vrot.slane %v1213_v34, %v315_v43  ;;  %v787_v37 = vrot.slane %v1213_v34, %v311_v45 }
 0x52f   :  { %1310 = vmatpush3.msra.mxu1 %v960_v38  ;;  %1345 = vmatpush3.msra.mxu0 %v992_v39  ;;  %v795_v38 = vrot.slane %v1213_v34, %v319_v46 }
 0x530   :  { %1311 = vmatprep.subr.mxu1 %v975_v26  ;;  %1346 = vmatprep.subr.mxu0 %v1007_v44 }
 0x531   :  { %1312 = vmatpush3.msra.mxu1 %v959_v47  ;;  %1347 = vmatpush3.msra.mxu0 %v991_v48 }
 0x532   :  { %1313 = vmatprep.subr.mxu1 %v974_v49  ;;  %1348 = vmatprep.subr.mxu0 %v1006_v40 }
 0x533   :  { %1314 = vmatpush3.msra.mxu1 %v958_v50  ;;  %1349 = vmatpush3.msra.mxu0 %v990_v51 }
 0x534   :  { %1315 = vmatprep.subr.mxu1 %v973_v52  ;;  %1350 = vmatprep.subr.mxu0 %v1005_v53 }
 0x535   :  { %1316 = vmatpush3.msra.mxu1 %v957_v54  ;;  %1351 = vmatpush3.msra.mxu0 %v989_v55 }
 0x536   :  { %1317 = vmatprep.subr.mxu1 %v972_v56  ;;  %1352 = vmatprep.subr.mxu0 %v1004_v57 }
 0x537   :  { %1318 = vmatpush3.msra.mxu1 %v956_v58  ;;  %1353 = vmatpush3.msra.mxu0 %v988_v59 }
 0x538   :  { %1319 = vmatprep.subr.mxu1 %v971_v60  ;;  %1354 = vmatprep.subr.mxu0 %v1003_v61 }
 0x539   :  { %1320 = vmatpush3.msra.mxu1 %v955_v62  ;;  %1355 = vmatpush3.msra.mxu0 %v987_v63 }
 0x53a   :  { %1321 = vmatprep.subr.mxu1 %v970_v1  ;;  %1356 = vmatprep.subr.mxu0 %v1002_v2 }
 0x53b   :  { %1322 = vmatpush3.msra.mxu1 %v954_v3  ;;  %1357 = vmatpush3.msra.mxu0 %v986_v4 }
 0x53c   :  { %1323 = vmatprep.subr.mxu1 %v969_v5  ;;  %1358 = vmatprep.subr.mxu0 %v1001_v6  ;;  %v1216_v5 = vld [vmem:[%s1779_s9] ss:$0 sm:$0xff] }
 0x53d   :  { %1324 = vmatpush3.msra.mxu1 %v953_v7  ;;  %1359 = vmatpush3.msra.mxu0 %v985_v9 }
 0x53e   :  { %1325 = vmatprep.subr.mxu1 %v968_v10  ;;  %1360 = vmatprep.subr.mxu0 %v1000_v0 }
 0x53f   :  { %1326 = vmatpush3.msra.mxu1 %v952_v11  ;;  %1361 = vmatpush3.msra.mxu0 %v984_v12 }
 0x540   :  { %1327 = vmatprep.subr.mxu1 %v967_v13  ;;  %1362 = vmatprep.subr.mxu0 %v999_v14 }
 0x541   :  { %1328 = vmatpush3.msra.mxu1 %v951_v15  ;;  %1363 = vmatpush3.msra.mxu0 %v983_v16 }
 0x542   :  { %1329 = vmatprep.subr.mxu1 %v966_v17  ;;  %1364 = vmatprep.subr.mxu0 %v998_v20 }
 0x543   :  { %1330 = vmatpush3.msra.mxu1 %v950_v18  ;;  %1365 = vmatpush3.msra.mxu0 %v982_v19 }
 0x544   :  { %1331 = vmatprep.subr.mxu1 %v965_v21  ;;  %1366 = vmatprep.subr.mxu0 %v997_v22 }
 0x545   :  { %1332 = vmatpush3.msra.mxu1 %v949_v23  ;;  %1367 = vmatpush3.msra.mxu0 %v981_v24 }
 0x546   :  { %1333 = vmatprep.subr.mxu1 %v964_v25  ;;  %1368 = vmatprep.subr.mxu0 %v996_v27 }
 0x547   :  { %1334 = vmatpush3.msra.mxu1 %v948_v28  ;;  %1369 = vmatpush3.msra.mxu0 %v980_v29 }
 0x548   :  { %1335 = vmatprep.subr.mxu1 %v963_v30  ;;  %1370 = vmatprep.subr.mxu0 %v995_v31 }
 0x549   :  { %1336 = vmatpush3.msra.mxu1 %v947_v32  ;;  %1371 = vmatpush3.msra.mxu0 %v979_v33 }
 0x5ea   :  { %v866_v39 = vpop.f32.mrf.mxu1  ;;  %v937_v26 = vpop.f32.mrf.mxu0 }
 0x5eb   :  { %v867_v44 = vadd.f32 %v866_v39, %v783_v35  ;;  %v938_v47 = vadd.f32 %v937_v26, %v791_v36 }
 0x5ec   :  { %v868_v48 = vpop.f32.mrf.mxu1  ;;  %v939_v49 = vpop.f32.mrf.mxu0 }
 0x5ed   :  { %v869_v40 = vadd.f32 %v868_v48, %v787_v37  ;;  %v940_v50 = vadd.f32 %v939_v49, %v795_v38  ;;  %v942_v42 = vmax.f32 %v867_v44, 0.0  ;;  %v944_v53 = vmax.f32 %v938_v47, 0.0 }
 0x5ef   :  { %v943_v51 = vmax.f32 %v869_v40, 0.0  ;;  %v945_v52 = vmax.f32 %v940_v50, 0.0 }
 0x5f1   :  { %1083 = vmatprep.mubr.f32.mxu1 %v943_v51  ;;  %1153 = vmatprep.mubr.f32.mxu0 %v945_v52 }
 0x5f2   :  { %1084 = vmatmul.mubr.f32.vlgmr.msra.gmra.mxu1 %v942_v42  ;;  %1154 = vmatmul.mubr.f32.vlgmr.msra.gmra.mxu0 %v944_v53 }
 0x6b2   :  { %v1337_v43 = vpop.f32.mrf.mxu1  ;;  %v1372_v45 = vpop.f32.mrf.mxu0 }
 0x6b4   :  { %v1338_v46 = vpop.f32.mrf.mxu1  ;;  %v1373_v54 = vpop.f32.mrf.mxu0 }
 0x6b5   :  { %v1339_v55 = vadd.f32 %v1338_v46, %v1337_v43  ;;  %v1374_v57 = vadd.f32 %v1373_v54, %v1372_v45 }
 0x6b7   :  { %v1086_v56 = vadd.f32 %v1339_v55, %v1215_v41 }
 0x6b9   :  { %v1156_v58 = vadd.f32 %v1374_v57, %v1086_v56 }
 0x6bb   :  { %v1159_v59 = vadd.f32 %v1156_v58, %v1734_v8  ;;  %v1217_v8 = vld [vmem:[%s1780_s10] ss:$0 sm:$0xff] }
 0x6bd   :  { %1162 = vadd.xlane.f32.xlu0 %v1159_v59 }
 0x746   :  { %v1163_v60 = vpop.xlane.xlu0 %1162 }
 0x747   :  { %v1164_v61 = vmul.f32 0.0078125, %v1163_v60 }
 0x749   :  { %v1165_v62 = vsub.f32 %v1159_v59, %v1164_v61 }
 0x74b   :  { %v1166_v63 = vmul.f32 %v1165_v62, %v1165_v62 }
 0x74d   :  { %1167 = vadd.xlane.f32.xlu1 %v1166_v63 }
 0x7d6   :  { %v1168_v1 = vpop.xlane.xlu1 %1167 }
 0x7d7   :  { %v1169_v2 = vmul.f32 0.0078125, %v1168_v1 }
 0x7d9   :  { %v1170_v3 = vadd.f32 1e-05, %v1169_v2 }
 0x7db   :  { %1429 = vrsqrt.f32 %v1170_v3 }
 0x7e8   :  { %v1430_v4 = vpop.eup %1429 }
 0x7e9   :  { %v1172_v6 = vmul.f32 %v1430_v4, %v1165_v62 }
 0x7eb   :  { %v1179_v7 = vmul.f32 %v1216_v5, %v1172_v6 }
 0x7ed   :  { %v1186_v9 = vadd.f32 %v1217_v8, %v1179_v7 }
 0x7ef   :  { %1187 = vst [vmem:[#allocation13] sm:$0xff] %v1186_v9 }
 0x7f0   :  { %1562 = shalt.err (!%p1559_p6)
}
 0x7f1   :  { %1197 = dma.vmem_to_hbm [thread:$0]  %s1195_s24, 128, %s1781_s11, [#allocation4]  }
 0x7f2   :  { %1579 = dma.done.wait [#allocation4], 128  }
 0x7f3   :  { %1580 = vsyncadd [#allocation4], 4294967168 }
 0x7f4   :  { %1201 = vsyncpa [#allocation3], 1 }
 0x7f5   :  { %1202 = vsyncpa [#allocation6], 1 }
 0x7f6   :  { %1203 = vsyncpa [#allocation9], 1 }
 0x7f7   :  { %1204 = vsyncpa [#allocation12], 1 }
 0x7f8   :  { %1205 = vsyncpa [#allocation4], 1 }

</bundles_post_ra>
